<compile_context>
chip_gen: v7x
topology: tpu7x:2x2x1
jax: 0.10.0
libtpu: 0.0.40
codegen_flags: <defaults>
</compile_context>

<pallas_src>
import functools

import jax
import jax.numpy as jnp
from jax import lax
from jax.experimental import pallas as pl
from jax.experimental.pallas import tpu as pltpu


def _round_up(x, m):
    return (x + m - 1) // m * m


def cnnnet_detach_kernel(
    x_ref,      # [Bt, tk]   f32   flattened-image tile
    w0_ref,     # [tk, 512]  bf16  stand-in pretrained feature extractor tile
    w1_ref,     # [512, H1p] bf16  fc1 weight (BN1 scale folded in)
    b1_ref,     # [1, H1p]   f32   folded BN1 shift
    w2_ref,     # [H1p, H2p] bf16  fc2 weight (BN2 scale folded in)
    b2_ref,     # [1, H2p]   f32   folded BN2 shift
    w3_ref,     # [H2p, Op]  bf16  fc3 weight
    b3_ref,     # [1, Op]    f32   fc3 bias
    o_ref,      # [Bt, Op]   f32
    feat_acc,   # [Bt, 512]  f32   VMEM scratch accumulator over Din tiles
):
    k = pl.program_id(1)

    @pl.when(k == 0)
    def _():
        feat_acc[...] = jnp.zeros_like(feat_acc)

    # Stand-in pretrained feature extractor, accumulated over the Din tiles.
    feat_acc[...] += jnp.dot(
        x_ref[...], w0_ref[...].astype(jnp.float32),
        preferred_element_type=jnp.float32)

    @pl.when(k == pl.num_programs(1) - 1)
    def _():
        feat = lax.stop_gradient(feat_acc[...])   # x.detach(): forward identity

        # clf_fc1: Linear(512, 500, bias=False) -> BatchNorm1d(500) -> ReLU
        h1 = jnp.maximum(
            jnp.dot(feat, w1_ref[...].astype(jnp.float32),
                    preferred_element_type=jnp.float32) + b1_ref[...], 0.0)

        # clf_fc2: Linear(500, 500, bias=False) -> BatchNorm1d(500) -> ReLU
        h2 = jnp.maximum(
            jnp.dot(h1, w2_ref[...].astype(jnp.float32),
                    preferred_element_type=jnp.float32) + b2_ref[...], 0.0)

        # clf_fc3: Linear(500, output_neuron_num) with bias
        y = jnp.dot(h2, w3_ref[...].astype(jnp.float32),
                    preferred_element_type=jnp.float32)
        o_ref[...] = y + b3_ref[...]


def make_params(key, in_features, output_neuron_num):
    """Deterministic parameter init mirroring the nn.Module shapes."""
    k0, k1, k2, k3, k3b = jax.random.split(key, 5)

    def linear_w(k, fan_in, fan_out):
        bound = 1.0 / jnp.sqrt(jnp.float32(fan_in))
        # stored as [fan_in, fan_out] (transposed vs torch) for x @ W
        return jax.random.uniform(k, (fan_in, fan_out), jnp.float32, -bound, bound)

    params = {}
    # stand-in pretrained feature extractor: flattened image -> 512
    params["w0"] = linear_w(k0, in_features, 512)
    # clf_fc1
    params["w1"] = linear_w(k1, 512, 500)
    params["bn1_gamma"] = jnp.ones((500,), jnp.float32)
    params["bn1_beta"] = jnp.zeros((500,), jnp.float32)
    params["bn1_mean"] = jnp.zeros((500,), jnp.float32)
    params["bn1_var"] = jnp.ones((500,), jnp.float32)
    # clf_fc2
    params["w2"] = linear_w(k2, 500, 500)
    params["bn2_gamma"] = jnp.ones((500,), jnp.float32)
    params["bn2_beta"] = jnp.zeros((500,), jnp.float32)
    params["bn2_mean"] = jnp.zeros((500,), jnp.float32)
    params["bn2_var"] = jnp.ones((500,), jnp.float32)
    # clf_fc3 (with bias)
    params["w3"] = linear_w(k3, 500, output_neuron_num)
    bound3 = 1.0 / jnp.sqrt(jnp.float32(500))
    params["b3"] = jax.random.uniform(
        k3b, (output_neuron_num,), jnp.float32, -bound3, bound3)
    return params


def _fold_bn(gamma, beta, mean, var, eps=1e-5):
    scale = gamma / jnp.sqrt(var + eps)
    shift = beta - mean * scale
    return scale, shift


def prepare_params(params, output_neuron_num, *, din_tile=512,
                   weight_dtype=jnp.bfloat16):
    """One-time prep: fold BN (eval mode) into weights, zero-pad every lane
    dimension to a multiple of 128 (Din to a multiple of din_tile), cast
    weights to bf16.  Zero padding keeps the math exact (padded lanes stay 0
    through ReLU and are sliced off)."""
    din = params["w0"].shape[0]
    din_p = _round_up(din, din_tile)
    H1 = params["w1"].shape[1]
    H2 = params["w2"].shape[1]
    H1p = _round_up(H1, 128)
    H2p = _round_up(H2, 128)
    Op = _round_up(output_neuron_num, 128)

    s1, b1 = _fold_bn(params["bn1_gamma"], params["bn1_beta"],
                      params["bn1_mean"], params["bn1_var"])
    s2, b2 = _fold_bn(params["bn2_gamma"], params["bn2_beta"],
                      params["bn2_mean"], params["bn2_var"])

    w0 = jnp.zeros((din_p, 512), jnp.float32).at[:din, :].set(params["w0"])
    # BN scales folded into weight columns; padded columns stay exactly zero.
    w1 = jnp.zeros((512, H1p), jnp.float32).at[:, :H1].set(
        params["w1"] * s1[None, :])
    w2 = jnp.zeros((H1p, H2p), jnp.float32).at[:H1, :H2].set(
        params["w2"] * s2[None, :])
    w3 = jnp.zeros((H2p, Op), jnp.float32).at[:H2, :output_neuron_num].set(
        params["w3"])
    b1p = jnp.zeros((1, H1p), jnp.float32).at[0, :H1].set(b1)
    b2p = jnp.zeros((1, H2p), jnp.float32).at[0, :H2].set(b2)
    b3p = jnp.zeros((1, Op), jnp.float32).at[0, :output_neuron_num].set(
        params["b3"])

    return {
        "w0": w0.astype(weight_dtype),
        "w1": w1.astype(weight_dtype),
        "b1": b1p,
        "w2": w2.astype(weight_dtype),
        "b2": b2p,
        "w3": w3.astype(weight_dtype),
        "b3": b3p,
    }


@functools.partial(jax.jit,
                   static_argnames=("output_neuron_num", "block_b", "din_tile"))
def cnnnet_detach_forward(x_nchw, prepared, output_neuron_num, *,
                          block_b=128, din_tile=512):
    B = x_nchw.shape[0]
    x = x_nchw.reshape(B, -1).astype(jnp.float32)
    din = x.shape[1]

    din_p = prepared["w0"].shape[0]          # multiple of din_tile
    H1p = prepared["w1"].shape[1]
    H2p = prepared["w2"].shape[1]
    Op = prepared["w3"].shape[1]
    assert din <= din_p and din_p % din_tile == 0

    Bt = max(8, min(block_b, _round_up(B, 8)))
    assert Bt % 8 == 0
    Bp = _round_up(B, Bt)

    x_pad = jnp.pad(x, ((0, Bp - B), (0, din_p - din)))

    grid = (Bp // Bt, din_p // din_tile)     # (batch parallel, Din reduction)

    out_padded = pl.pallas_call(
        cnnnet_detach_kernel,
        out_shape=jax.ShapeDtypeStruct((Bp, Op), jnp.float32),
        grid_spec=pltpu.PrefetchScalarGridSpec(
            num_scalar_prefetch=0,
            grid=grid,
            in_specs=[
                pl.BlockSpec((Bt, din_tile), lambda i, k: (i, k)),   # x
                pl.BlockSpec((din_tile, 512), lambda i, k: (k, 0)),  # w0
                pl.BlockSpec((512, H1p), lambda i, k: (0, 0)),       # w1
                pl.BlockSpec((1, H1p), lambda i, k: (0, 0)),         # b1
                pl.BlockSpec((H1p, H2p), lambda i, k: (0, 0)),       # w2
                pl.BlockSpec((1, H2p), lambda i, k: (0, 0)),         # b2
                pl.BlockSpec((H2p, Op), lambda i, k: (0, 0)),        # w3
                pl.BlockSpec((1, Op), lambda i, k: (0, 0)),          # b3
            ],
            out_specs=pl.BlockSpec((Bt, Op), lambda i, k: (i, 0)),
            scratch_shapes=[pltpu.VMEM((Bt, 512), jnp.float32)],
        ),
        compiler_params=pltpu.CompilerParams(
            dimension_semantics=("parallel", "arbitrary")),
    )(x_pad, prepared["w0"], prepared["w1"], prepared["b1"],
      prepared["w2"], prepared["b2"], prepared["w3"], prepared["b3"])

    return out_padded[:B, :output_neuron_num]


def _reference(x_nchw, prepared, output_neuron_num):
    """Pure-JAX reference using the same prepared (folded/padded/bf16) params."""
    B = x_nchw.shape[0]
    x = x_nchw.reshape(B, -1).astype(jnp.float32)
    din = x.shape[1]
    din_p = prepared["w0"].shape[0]
    x = jnp.pad(x, ((0, 0), (0, din_p - din)))
    feat = lax.stop_gradient(x @ prepared["w0"].astype(jnp.float32))
    h1 = jnp.maximum(feat @ prepared["w1"].astype(jnp.float32)
                     + prepared["b1"], 0.0)
    h2 = jnp.maximum(h1 @ prepared["w2"].astype(jnp.float32)
                     + prepared["b2"], 0.0)
    y = h2 @ prepared["w3"].astype(jnp.float32) + prepared["b3"]
    return y[:, :output_neuron_num]


if __name__ == "__main__":
    key = jax.random.PRNGKey(0)
    k_x, k_p = jax.random.split(key)

    B, C, H, W = 16, 4, 16, 16          # NCHW image input (Din = 1024)
    output_neuron_num = 10

    x = jax.random.normal(k_x, (B, C, H, W), jnp.float32)
    params = make_params(k_p, C * H * W, output_neuron_num)

    # One-time prep (BN fold + pad + bf16 cast), hoisted out of the forward.
    prepared = prepare_params(params, output_neuron_num, din_tile=512)
    prepared = jax.block_until_ready(prepared)

    # block_b=8 keeps tiles small for this toy batch while still exercising
    # both grid axes (2 batch blocks x 2 Din blocks); use 128/256 in practice.
    out = cnnnet_detach_forward(x, prepared, output_neuron_num,
                                block_b=8, din_tile=512)
    out = jax.block_until_ready(out)

    ref = _reference(x, prepared, output_neuron_num)
    assert out.shape == (B, output_neuron_num)
    assert jnp.allclose(out, ref, atol=2e-3, rtol=2e-3), \
        float(jnp.max(jnp.abs(out - ref)))

    print("KERNEL_OK")
</pallas_src>

<mosaic_0001>
module attributes {stable_mosaic.version = 11 : i64} {
  func.func @cnnnet_detach_kernel(%arg0: i32, %arg1: i32, %arg2: memref<8x512xf32, #tpu.memory_space<vmem>>, %arg3: memref<512x512xbf16, #tpu.memory_space<vmem>>, %arg4: memref<512x512xbf16, #tpu.memory_space<vmem>>, %arg5: memref<1x512xf32, #tpu.memory_space<vmem>>, %arg6: memref<512x512xbf16, #tpu.memory_space<vmem>>, %arg7: memref<1x512xf32, #tpu.memory_space<vmem>>, %arg8: memref<512x128xbf16, #tpu.memory_space<vmem>>, %arg9: memref<1x128xf32, #tpu.memory_space<vmem>>, %arg10: memref<8x128xf32, #tpu.memory_space<vmem>>, %arg11: memref<8x512xf32, #tpu.memory_space<vmem>>) attributes {dimension_semantics = [#tpu.dimension_semantics<parallel>, #tpu.dimension_semantics<arbitrary>], iteration_bounds = array<i64: 2, 2>, scalar_prefetch = 0 : i64, scratch_operands = 1 : i64, tpu.core_type = #tpu.core_type<tc>, window_params = [{transform_indices = @transform_0, window_bounds = array<i64: 8, 512>}, {transform_indices = @transform_1, window_bounds = array<i64: 512, 512>}, {pipeline_mode = #tpu.pipeline_mode<synchronous>, transform_indices = @transform_2, window_bounds = array<i64: 512, 512>}, {pipeline_mode = #tpu.pipeline_mode<synchronous>, transform_indices = @transform_3, window_bounds = array<i64: 1, 512>}, {pipeline_mode = #tpu.pipeline_mode<synchronous>, transform_indices = @transform_4, window_bounds = array<i64: 512, 512>}, {pipeline_mode = #tpu.pipeline_mode<synchronous>, transform_indices = @transform_5, window_bounds = array<i64: 1, 512>}, {pipeline_mode = #tpu.pipeline_mode<synchronous>, transform_indices = @transform_6, window_bounds = array<i64: 512, 128>}, {pipeline_mode = #tpu.pipeline_mode<synchronous>, transform_indices = @transform_7, window_bounds = array<i64: 1, 128>}, {transform_indices = @transform_8, window_bounds = array<i64: 8, 128>}]} {
    %c0_i32 = arith.constant 0 : i32
    %0 = arith.cmpi eq, %arg1, %c0_i32 : i32
    %1 = arith.extui %0 : i1 to i32
    %c0_i32_0 = arith.constant 0 : i32
    %2 = arith.cmpi ne, %1, %c0_i32_0 : i32
    scf.if %2 {
      %cst_9 = arith.constant 0.000000e+00 : f32
      %13 = vector.broadcast %cst_9 : f32 to vector<8x512xf32>
      %c0_10 = arith.constant 0 : index
      %c0_11 = arith.constant 0 : index
      %14 = vector.load %arg11[%c0_10, %c0_11] : memref<8x512xf32, #tpu.memory_space<vmem>>, vector<8x512xf32>
      tpu.vector_store %arg11[%c0_10, %c0_11], %13 {strides = array<i32>} : memref<8x512xf32, #tpu.memory_space<vmem>>, vector<8x512xf32>,
    } else {
    }
    %c0 = arith.constant 0 : index
    %c0_1 = arith.constant 0 : index
    %3 = vector.load %arg11[%c0, %c0_1] : memref<8x512xf32, #tpu.memory_space<vmem>>, vector<8x512xf32>
    %c0_2 = arith.constant 0 : index
    %c0_3 = arith.constant 0 : index
    %4 = vector.load %arg2[%c0_2, %c0_3] : memref<8x512xf32, #tpu.memory_space<vmem>>, vector<8x512xf32>
    %c0_4 = arith.constant 0 : index
    %c0_5 = arith.constant 0 : index
    %5 = vector.load %arg3[%c0_4, %c0_5] : memref<512x512xbf16, #tpu.memory_space<vmem>>, vector<512x512xbf16>
    %6 = arith.extf %5 : vector<512x512xbf16> to vector<512x512xf32>
    %cst = arith.constant dense<0.000000e+00> : vector<8x512xf32>
    %7 = tpu.matmul %4, %6, %cst {dimension_numbers = #tpu.dot_dimension_numbers<[1], [0], [0], [1], [0, 0, 1, 1], [], []>} : vector<8x512xf32>, vector<512x512xf32>, vector<8x512xf32> -> vector<8x512xf32>
    %8 = arith.addf %3, %7 : vector<8x512xf32>
    %c0_6 = arith.constant 0 : index
    %c0_7 = arith.constant 0 : index
    %9 = vector.load %arg11[%c0_6, %c0_7] : memref<8x512xf32, #tpu.memory_space<vmem>>, vector<8x512xf32>
    tpu.vector_store %arg11[%c0_6, %c0_7], %8 {strides = array<i32>} : memref<8x512xf32, #tpu.memory_space<vmem>>, vector<8x512xf32>,
    %c1_i32 = arith.constant 1 : i32
    %10 = arith.cmpi eq, %arg1, %c1_i32 : i32
    %11 = arith.extui %10 : i1 to i32
    %c0_i32_8 = arith.constant 0 : i32
    %12 = arith.cmpi ne, %11, %c0_i32_8 : i32
    scf.if %12 {
      %c0_9 = arith.constant 0 : index
      %c0_10 = arith.constant 0 : index
      %13 = vector.load %arg11[%c0_9, %c0_10] : memref<8x512xf32, #tpu.memory_space<vmem>>, vector<8x512xf32>
      %c0_11 = arith.constant 0 : index
      %c0_12 = arith.constant 0 : index
      %14 = vector.load %arg4[%c0_11, %c0_12] : memref<512x512xbf16, #tpu.memory_space<vmem>>, vector<512x512xbf16>
      %15 = arith.extf %14 : vector<512x512xbf16> to vector<512x512xf32>
      %cst_13 = arith.constant dense<0.000000e+00> : vector<8x512xf32>
      %16 = tpu.matmul %13, %15, %cst_13 {dimension_numbers = #tpu.dot_dimension_numbers<[1], [0], [0], [1], [0, 0, 1, 1], [], []>} : vector<8x512xf32>, vector<512x512xf32>, vector<8x512xf32> -> vector<8x512xf32>
      %c0_14 = arith.constant 0 : index
      %c0_15 = arith.constant 0 : index
      %17 = vector.load %arg5[%c0_14, %c0_15] : memref<1x512xf32, #tpu.memory_space<vmem>>, vector<1x512xf32>
      %18 = vector.broadcast %17 : vector<1x512xf32> to vector<8x512xf32>
      %19 = arith.addf %16, %18 : vector<8x512xf32>
      %cst_16 = arith.constant 0.000000e+00 : f32
      %20 = vector.broadcast %cst_16 : f32 to vector<8x512xf32>
      %21 = arith.maximumf %19, %20 : vector<8x512xf32>
      %c0_17 = arith.constant 0 : index
      %c0_18 = arith.constant 0 : index
      %22 = vector.load %arg6[%c0_17, %c0_18] : memref<512x512xbf16, #tpu.memory_space<vmem>>, vector<512x512xbf16>
      %23 = arith.extf %22 : vector<512x512xbf16> to vector<512x512xf32>
      %cst_19 = arith.constant dense<0.000000e+00> : vector<8x512xf32>
      %24 = tpu.matmul %21, %23, %cst_19 {dimension_numbers = #tpu.dot_dimension_numbers<[1], [0], [0], [1], [0, 0, 1, 1], [], []>} : vector<8x512xf32>, vector<512x512xf32>, vector<8x512xf32> -> vector<8x512xf32>
      %c0_20 = arith.constant 0 : index
      %c0_21 = arith.constant 0 : index
      %25 = vector.load %arg7[%c0_20, %c0_21] : memref<1x512xf32, #tpu.memory_space<vmem>>, vector<1x512xf32>
      %26 = vector.broadcast %25 : vector<1x512xf32> to vector<8x512xf32>
      %27 = arith.addf %24, %26 : vector<8x512xf32>
      %cst_22 = arith.constant 0.000000e+00 : f32
      %28 = vector.broadcast %cst_22 : f32 to vector<8x512xf32>
      %29 = arith.maximumf %27, %28 : vector<8x512xf32>
      %c0_23 = arith.constant 0 : index
      %c0_24 = arith.constant 0 : index
      %30 = vector.load %arg8[%c0_23, %c0_24] : memref<512x128xbf16, #tpu.memory_space<vmem>>, vector<512x128xbf16>
      %31 = arith.extf %30 : vector<512x128xbf16> to vector<512x128xf32>
      %cst_25 = arith.constant dense<0.000000e+00> : vector<8x128xf32>
      %32 = tpu.matmul %29, %31, %cst_25 {dimension_numbers = #tpu.dot_dimension_numbers<[1], [0], [0], [1], [0, 0, 1, 1], [], []>} : vector<8x512xf32>, vector<512x128xf32>, vector<8x128xf32> -> vector<8x128xf32>
      %c0_26 = arith.constant 0 : index
      %c0_27 = arith.constant 0 : index
      %33 = vector.load %arg9[%c0_26, %c0_27] : memref<1x128xf32, #tpu.memory_space<vmem>>, vector<1x128xf32>
      %34 = vector.broadcast %33 : vector<1x128xf32> to vector<8x128xf32>
      %35 = arith.addf %32, %34 : vector<8x128xf32>
      %c0_28 = arith.constant 0 : index
      %c0_29 = arith.constant 0 : index
      %36 = vector.load %arg10[%c0_28, %c0_29] : memref<8x128xf32, #tpu.memory_space<vmem>>, vector<8x128xf32>
      tpu.vector_store %arg10[%c0_28, %c0_29], %35 {strides = array<i32>} : memref<8x128xf32, #tpu.memory_space<vmem>>, vector<8x128xf32>,
    } else {
    }
    return
  }
  func.func @transform_0(%arg0: i32, %arg1: i32) -> (i32, i32) {
    %c0_i32 = arith.constant 0 : i32
    return %arg0, %arg1 : i32, i32
  }
  func.func @transform_1(%arg0: i32, %arg1: i32) -> (i32, i32) {
    %c0_i32 = arith.constant 0 : i32
    %c0_i32_0 = arith.constant 0 : i32
    return %arg1, %c0_i32 : i32, i32
  }
  func.func @transform_2(%arg0: i32, %arg1: i32) -> (i32, i32) {
    %c0_i32 = arith.constant 0 : i32
    %c0_i32_0 = arith.constant 0 : i32
    %c0_i32_1 = arith.constant 0 : i32
    return %c0_i32, %c0_i32_0 : i32, i32
  }
  func.func @transform_3(%arg0: i32, %arg1: i32) -> (i32, i32) {
    %c0_i32 = arith.constant 0 : i32
    %c0_i32_0 = arith.constant 0 : i32
    %c0_i32_1 = arith.constant 0 : i32
    return %c0_i32, %c0_i32_0 : i32, i32
  }
  func.func @transform_4(%arg0: i32, %arg1: i32) -> (i32, i32) {
    %c0_i32 = arith.constant 0 : i32
    %c0_i32_0 = arith.constant 0 : i32
    %c0_i32_1 = arith.constant 0 : i32
    return %c0_i32, %c0_i32_0 : i32, i32
  }
  func.func @transform_5(%arg0: i32, %arg1: i32) -> (i32, i32) {
    %c0_i32 = arith.constant 0 : i32
    %c0_i32_0 = arith.constant 0 : i32
    %c0_i32_1 = arith.constant 0 : i32
    return %c0_i32, %c0_i32_0 : i32, i32
  }
  func.func @transform_6(%arg0: i32, %arg1: i32) -> (i32, i32) {
    %c0_i32 = arith.constant 0 : i32
    %c0_i32_0 = arith.constant 0 : i32
    %c0_i32_1 = arith.constant 0 : i32
    return %c0_i32, %c0_i32_0 : i32, i32
  }
  func.func @transform_7(%arg0: i32, %arg1: i32) -> (i32, i32) {
    %c0_i32 = arith.constant 0 : i32
    %c0_i32_0 = arith.constant 0 : i32
    %c0_i32_1 = arith.constant 0 : i32
    return %c0_i32, %c0_i32_0 : i32, i32
  }
  func.func @transform_8(%arg0: i32, %arg1: i32) -> (i32, i32) {
    %c0_i32 = arith.constant 0 : i32
    %c0_i32_0 = arith.constant 0 : i32
    return %arg0, %c0_i32 : i32, i32
  }
}

</mosaic_0001>

<bundles_post_ra>
// kernel: cnnnet_detach_forward.1
= control target key start
LH: loop header
LB: loop body
LE: loop exit
PB: predicated region body
PF: predicated region fallthrough
CT: control target
= control target key end

     0   :  { %s6235_s0 = inlined_call_operand.vmem [shape: f32[16,1024], index: 0, kind: input, shape index: {}]   ;;  %s6236_s1 = inlined_call_operand.hbm [shape: bf16[1024,512], index: 1, kind: input, shape index: {}]   ;;  %s6237_s2 = inlined_call_operand.vmem [shape: bf16[512,512], index: 2, kind: input, shape index: {}]   ;;  %s6238_s3 = inlined_call_operand.vmem [shape: f32[1,512], index: 3, kind: input, shape index: {}]   ;;  %s6239_s4 = inlined_call_operand.hbm [shape: bf16[512,512], index: 4, kind: input, shape index: {}]   ;;  %s6240_s5 = inlined_call_operand.vmem [shape: f32[1,512], index: 5, kind: input, shape index: {}]   ;;  %s6241_s6 = inlined_call_operand.hbm [shape: bf16[512,128], index: 6, kind: input, shape index: {}]   ;;  %s6242_s7 = inlined_call_operand.vmem [shape: f32[1,128], index: 7, kind: input, shape index: {}]   ;;  %s6243_s8 = inlined_call_operand.hbm [shape: f32[16,128], index: 8, kind: output, shape index: {}]  }
   0x1   :  { %6256 = sst [smem:[#allocation16_spill]] %s6238_s3 }
   0x2   :  { %6257 = sst [smem:[#allocation17_spill]] %s6239_s4 }
   0x3   :  { %6258 = sst [smem:[#allocation18_spill]] %s6240_s5 }
   0x4   :  { %6259 = sst [smem:[#allocation19_spill]] %s6241_s6 }
   0x5   :  { %6260 = sst [smem:[#allocation20_spill]] %s6242_s7 }
   0x6   :  { %6261 = sst [smem:[#allocation21_spill]] %s6243_s8 }
   0x7   :  { %13 = vsyncpa [#allocation4], 0 }
   0x8   :  { %15 = vsyncpa [#allocation4 + $0x1], 0 }
   0x9   :  { %16 = vsyncpa [#allocation7], 0 }
   0xa   :  { %17 = vsyncpa [#allocation5], 0 }
   0xb   :  { %19 = vsyncpa [#allocation5 + $0x1], 0  ;;  %s5363_s27 = smov 0   ;;  %s5365_s28 = smov 0  }
   0xc   :  { %s5367_s29 = smov 0   ;;  %s5369_s30 = smov 0  }
   0xd   :  { %s5371_s9 = smov 0   ;;  %s5373_s10 = smov 0  }
   0xe   :  { %s5375_s11 = smov 0   ;;  %s5377_s12 = smov 0  }
   0xf   :  { %s5379_s13 = smov 0   ;;  %s5381_s14 = smov 0  }
  0x10   :  { %s5383_s15 = smov 0  }
  0x11 LB: > { %6262 = sst [smem:[#allocation13_spill]] %s5267_s27  ;;  %s2899_s16 = sadd.s32 4294967295, %s5307_s15   ;;  %s5307_s15 = sphi %s5383_s15, %s25_s15   ;;  %s5303_s14 = sphi %s5381_s14, %s6300_s14   ;;  %s5299_s13 = sphi %s5379_s13, %s6299_s13   ;;  %s5295_s12 = sphi %s5377_s12, %s6298_s12   ;;  %s5291_s11 = sphi %s5375_s11, %s6297_s11   ;;  %s5287_s10 = sphi %s5373_s10, %s6296_s10   ;;  %s5283_s9 = sphi %s5371_s9, %s6295_s9   ;;  %s5279_s30 = sphi %s5369_s30, %s6294_s30   ;;  %s5275_s29 = sphi %s5367_s29, %s6293_s29   ;;  %s5271_s28 = sphi %s5365_s28, %s6292_s28   ;;  %s5267_s27 = sphi %s5363_s27, %s6291_s27  }
  0x12   : > { %s2900_s17 = sadd.s32 4294967294, %s5307_s15   ;;  %p85_p0 = scmp.ne.s32.totalorder %s5283_s9, %s5279_s30 }
  0x13   : > { %p5419_p1 = scmp.eq.s32.totalorder %s2899_s16, 0  ;;  %p234_p2 = scmp.ne.s32.totalorder %s5275_s29, %s5271_s28 }
  0x14   : > { %p235_p4 = scmp.eq.s32.totalorder %s2899_s16, 3  ;;  %p240_p5 = scmp.ne.s32.totalorder %s5271_s28, %s5267_s27 }
  0x15   : > { %s6263_s18 = scalar_select %p5419_p1, 1, 0 }
  0x16   : > { %p5428_p3 = por %p5419_p1, %p85_p0  ;;  %p241_p6 = scmp.eq.s32.totalorder %s2900_s17, 3 }
  0x17   : > { %p5434_p7 = por %p235_p4, %p234_p2  ;;  %p2901_p8 = scmp.ge.s32.totalorder %s5307_s15, 1 }
  0x18   : > { %s6264_s20 = scalar_select %p5428_p3, 1, 0 }
  0x19   : > { %s6265_s21 = scalar_select %p5434_p7, 1, 0 }
  0x1a   : > { %p5439_p9 = por %p241_p6, %p240_p5  ;;  %p248_p10 = scmp.lt.s32.totalorder %s5307_s15, 5 }
  0x1b   : > { %6266 = sst [smem:[#allocation14_spill]] %s6265_s21  ;;  %s5309_s24 = smov [#allocation6]  }
  0x1c   : > { %s6267_s22 = scalar_select %p5439_p9, 1, 0 }
  0x1d   : > { %p5444_p11 = pnand %p2901_p8, %p248_p10  ;;  %s266_s25 = sshll.u32 %s5309_s24, 4  ;;  %s267_s25 = int_to_ptr.vmem [resolvable:$true] %s266_s25 }
  0x1e   : > { %6268 = sst [smem:[#allocation15_spill]] %s6267_s22  ;;  %s5310_s30 = smov [#allocation8]  }
  0x1f   : > { %s6269_s23 = scalar_select %p5444_p11, 1, 0 }
  0x20   : > { %p4403_p12 = pneg %p5444_p11  ;;  %s282_s16 = sshll.u32 %s5310_s30, 4  ;;  %s5456_s16 = int_to_ptr.vmem [resolvable:$true] %s282_s16 }
  0x21   : > { %s6271_s4 = sld [smem:[#allocation17_spill]] }
  0x22   : > { %p5452_p13 = pnand %p4403_p12, %p5419_p1 }
  0x24   : > { %p5097_p2 = pneg %p5452_p13 }
  0x27   : > { %s5095_s22 = scalar_lea.hbm %s6271_s4, 16384 }
  0x28   : > { %p5096_p0 = scmp.ne.s32.totalorder %s6271_s4, %s5095_s22  ;;  %p5102_p6 = scmp.lt.u32.totalorder %s5095_s22, %s6271_s4 }
  0x2a   : > { %p5098_p4 = pnand %p5097_p2, %p5096_p0 }
  0x2c   : > { %p5099_p5 = pneg %p5098_p4 }
  0x2e   : > { %p5104_p8 = pnand %p5102_p6, %p5099_p5 }
  0x30   : > { %5107 = shalt.err (!%p5104_p8)
}
  0x31   : > { %s5108_s30 = scalar_lea.vmem %s267_s25, 16384  ;;  %p5116_p7 = scmp.lt.s32.totalorder %s267_s25, %s267_s25 }
  0x32   : > { %p5109_p10 = scmp.ne.s32.totalorder %s267_s25, %s5108_s30  ;;  %p5117_p1 = scmp.lt.s32.totalorder %s5108_s30, %s5108_s30 }
  0x34   : > { %p5111_p12 = pnand %p5109_p10, %p5097_p2  ;;  %p5118_p3 = por %p5117_p1, %p5116_p7 }
  0x36   : > { %p5112_p9 = pneg %p5111_p12 }
  0x38   : > { %p5119_p11 = pnand %p5118_p3, %p5112_p9 }
  0x3a   : > { %5122 = shalt.err (!%p5119_p11)
}
  0x3b   : > { %s6254_s27 = smov 256   ;;  %s6255_s19 = smov 16  }
  0x3c   : > { %4406 = dma.hbm_to_vmem [thread:$0]  (!%p5452_p13), %s6271_s4, 16384, %s267_s25, [#allocation7], %s6254_s27, %s6254_s27, %s6255_s19  }
  0x3d   : > { %s6272_s6 = sld [smem:[#allocation19_spill]] }
  0x43   : > { %s5123_s24 = scalar_lea.hbm %s6272_s6, 4096 }
  0x44   : > { %p5124_p1 = scmp.ne.s32.totalorder %s6272_s6, %s5123_s24  ;;  %p5130_p9 = scmp.lt.u32.totalorder %s5123_s24, %s6272_s6 }
  0x46   : > { %p5126_p3 = pnand %p5124_p1, %p5097_p2 }
  0x48   : > { %p5127_p7 = pneg %p5126_p3 }
  0x4a   : > { %p5132_p11 = pnand %p5130_p9, %p5127_p7 }
  0x4c   : > { %5135 = shalt.err (!%p5132_p11)
}
  0x4d   : > { %s5136_s25 = scalar_lea.vmem %s5456_s16, 4096  ;;  %p5144_p6 = scmp.lt.s32.totalorder %s5456_s16, %s5456_s16 }
  0x4e   : > { %p5137_p0 = scmp.ne.s32.totalorder %s5456_s16, %s5136_s25  ;;  %p5145_p8 = scmp.lt.s32.totalorder %s5136_s25, %s5136_s25 }
  0x50   : > { %p5139_p4 = pnand %p5137_p0, %p5097_p2  ;;  %p5146_p10 = por %p5145_p8, %p5144_p6 }
  0x52   : > { %p5140_p5 = pneg %p5139_p4 }
  0x54   : > { %p5147_p12 = pnand %p5146_p10, %p5140_p5 }
  0x56   : > { %5150 = shalt.err (!%p5147_p12)
}
  0x57   : > { %s5313_s3 = smov 64   ;;  %s5314_s5 = smov 4  }
  0x58   : > { %4409 = dma.hbm_to_vmem [thread:$0]  (!%p5452_p13), %s6272_s6, 4096, %s5456_s16, [#allocation7], %s5313_s3, %s5313_s3, %s5314_s5  }
  0x59   : > { %s34_s21 = sadd.s32 1, %s5299_s13  ;;  %s37_s22 = sadd.s32 1, %s5303_s14 }
  0x5a   : > { %p35_p2 = scmp.ge.s32.totalorder %s34_s21, 2  ;;  %s72_s17 = sadd.s32 1, %s5287_s10 }
  0x5b   : > { %p79_p1 = scmp.ne.s32.totalorder %s5287_s10, %s5283_s9  ;;  %p80_p3 = scmp.eq.s32.totalorder %s5307_s15, 0 }
  0x5c   : > { %s6302_s21 = smov (%p35_p2, %s34_s21), 0  ;;  %s6304_s22 = smov (!%p35_p2, %s37_s22), %s5303_s14 }
  0x5d   : > { %s69_s26 = ssub.s32 %s5299_s13, %s6302_s21  ;;  %p5519_p7 = por %p80_p3, %p79_p1 }
  0x5e   : > { %p39_p13 = scmp.ge.s32.totalorder %s6304_s22, 2  ;;  %p70_p9 = scmp.eq.s32.totalorder %s69_s26, 0 }
  0x5f   : > { %p4420_p11 = scmp.lt.s32.totalorder %s5307_s15, 4  ;;  %s312_s16 = sand.u32 1, %s5287_s10  }
  0x60   : > { %s6306_s22 = smov (%p39_p13, %s6304_s22), 0  ;;  %s2905_s3 = sshll.u32 %s312_s16, 10 }
  0x61   : > { %s5528_s30 = scalar_select %p70_p9, %s5287_s10, %s72_s17  }
  0x62   : > { %s221_s25 = ssub.s32 %s5303_s14, %s6306_s22  ;;  %s2925_s5 = sshll.u32 %s5299_s13, 14 }
  0x63   : > { %p222_p0 = scmp.eq.s32.totalorder %s221_s25, 0  ;;  %s6274_s7 = sadd.s32 1, %s5275_s29 }
  0x64   : > { %s5541_s4 = scalar_lea.hbm %s6236_s1, %s2925_s5  ;;  %s316_s26 = scalar_lea.vmem [#allocation3], %s2905_s3 }
  0x65   : > { %s5536_s8 = scalar_select %p222_p0, %s5275_s29, %s6274_s7  }
  0x66   : > { %s324_s6 = sshll.u32 %s316_s26, 4  ;;  %p5549_p4 = pnand %p4420_p11, %p5519_p7  ;;  %s5543_s6 = int_to_ptr.vmem [resolvable:$true] %s324_s6 }
  0x67   : > { %s5553_s25 = scalar_lea.sflag [#allocation4], %s312_s16  ;;  %s5151_s27 = scalar_lea.hbm %s5541_s4, 16384 }
  0x68   : > { %p5152_p5 = scmp.ne.s32.totalorder %s5541_s4, %s5151_s27  ;;  %p5153_p6 = pneg %p5549_p4 }
  0x69   : > { %s5156_s24 = scalar_lea.hbm %s6236_s1, 32768  ;;  %p5157_p12 = scmp.lt.u32.totalorder %s5541_s4, %s6236_s1 }
  0x6a   : > { %p5154_p8 = pnand %p5153_p6, %p5152_p5  ;;  %p5158_p2 = scmp.lt.u32.totalorder %s5156_s24, %s5151_s27 }
  0x6b   : > { %p5160_p3 = scmp.lt.u32.totalorder %s5151_s27, %s5541_s4 }
  0x6c   : > { %p5155_p10 = pneg %p5154_p8  ;;  %p5159_p1 = por %p5158_p2, %p5157_p12 }
  0x6e   : > { %p5161_p7 = por %p5160_p3, %p5159_p1 }
  0x70   : > { %p5162_p13 = pnand %p5161_p7, %p5155_p10 }
  0x72   : > { %5165 = shalt.err (!%p5162_p13)
}
  0x73   : > { %s5166_s16 = scalar_lea.vmem %s5543_s6, 16384  ;;  %s5315_s26 = smov [#allocation3]  }
  0x74   : > { %p5167_p9 = scmp.ne.s32.totalorder %s5543_s6, %s5166_s16  ;;  %s5171_s19 = sshll.u32 %s5315_s26, 4  ;;  %s5172_s19 = int_to_ptr.vmem [resolvable:$false] %s5171_s19 }
  0x75   : > { %s5173_s3 = scalar_lea.vmem %s5172_s19, 32768  ;;  %p5174_p5 = scmp.lt.s32.totalorder %s5543_s6, %s5172_s19 }
  0x76   : > { %p5169_p11 = pnand %p5167_p9, %p5153_p6  ;;  %p5175_p8 = scmp.lt.s32.totalorder %s5173_s3, %s5166_s16 }
  0x78   : > { %p5170_p0 = pneg %p5169_p11  ;;  %p5176_p12 = por %p5175_p8, %p5174_p5 }
  0x7a   : > { %p5177_p2 = pnand %p5176_p12, %p5170_p0 }
  0x7c   : > { %5180 = shalt.err (!%p5177_p2)
}
  0x7d   : > { %s6276_s27 = smov 16   ;;  %s6277_s24 = smov 256  }
  0x7e   : > { %4413 = dma.hbm_to_vmem [thread:$0]  (!%p5549_p4), %s5541_s4, 16384, %s5543_s6, %s5553_s25, %s6277_s24, %s6277_s24, %s6276_s27  }
  0x7f   : > { %p6278_p6 = scmp.ne.s32.totalorder %s6269_s23, 0 }
  0x80   : > { %s338_s5 = sand.u32 (!%p6278_p6), 1, %s5283_s9   ;;  %p6279_p10 = scmp.ne.s32.totalorder (!%p6278_p6), %s6264_s20, 0 }
  0x81   : > { %336 = sbr.rel (%p6278_p6) target bundleno = 1318 (0x526), region = 52  ;;  %s2910_s7 = sshll.u32 (!%p6278_p6), %s338_s5, 10 }
  0x82   : > { %s339_s16 = scalar_lea.sflag (!%p6278_p6), [#allocation4], %s338_s5  ;;  %s5587_s26 = scalar_lea.vmem (!%p6278_p6), [#allocation3], %s2910_s7 }
  0x88   : > { %5254 = dma.done.wait (%p6279_p10), %s339_s16, 16384  }
  0x89   : > { %5256 = vsyncadd (%p6279_p10), %s339_s16, 4294950912  ;;  %p6280_p1 = scmp.ne.s32.totalorder %s6263_s18, 0 }
  0x8b   : > { %5258 = dma.done.wait (%p6280_p1), [#allocation7], 20480  }
  0x8c   : > { %5260 = vsyncadd (%p6280_p1), [#allocation7], 4294946816  ;;  %s389_s4 = sand.u32 1, %s5271_s28   ;;  %s2914_s6 = sshll.u32 %s5291_s11, 2 }
  0x8d   : > { %s5601_s23 = sshll.u32 %s389_s4, 3  ;;  %p393_p4 = scmp.lt.s32.totalorder %s5295_s12, 1 }
  0x8e   : > { %p395_p3 = scmp.lt.s32.totalorder %s2914_s6, 7  ;;  %s391_s24 = scalar_lea.vmem [#allocation9], %s5601_s23 }
  0x8f   : > { %s394_s20 = scalar_select %p393_p4, %s5295_s12, 1 }
  0x90   : > { %s6308_s6 = smov (!%p395_p3, %s2914_s6), 7  ;;  %p2917_p7 = scmp.ne.s32.totalorder %s5291_s11, 0 }
  0x91   : > { %s2915_s17 = sshll.u32 %s394_s20, 3  ;;  %v5316_v0 = vmov (!%p2917_p7), 0.0  }
  0x92   : > { %s398_s25 = sadd.s32 %s2915_s17, %s6308_s6  ;;  %406 = sbr.rel (%p2917_p7) target bundleno = 153 (0x99), region = 68  ;;  %407 = vst [vmem:[#allocation2] sm:$0xff] (!%p2917_p7), %v5316_v0  ;;  %408 = vst [vmem:[#allocation2 + $0x8] sm:$0xff] (!%p2917_p7), %v5316_v0 }
  0x93   : > { %s2916_s19 = sshll.u32 %s398_s25, 3  ;;  %409 = vst [vmem:[#allocation2 + $0x10] sm:$0xff] (!%p2917_p7), %v5316_v0  ;;  %410 = vst [vmem:[#allocation2 + $0x18] sm:$0xff] (!%p2917_p7), %v5316_v0 }
  0x94   : > { %s5608_s27 = scalar_lea.vmem %s6235_s0, %s2916_s19 }
  0x99 PF: > { %v4519_v1 = vld [vmem:[%s5587_s26 + $0x4] ss:$16 sps:$4 sm:$0xff]   ;;  %v4521_v2 = vld [vmem:[%s5587_s26 + $0xc] ss:$16 sps:$4 sm:$0xff]   ;;  %v4523_v3 = vld [vmem:[%s5587_s26] ss:$16 sps:$4 sm:$0xff]  }
  0x9a   : > { %3156 = vmatprep.subr.bf16.mxu0 %v4519_v1  ;;  %v4524_v4 = vld [vmem:[%s5587_s26 + $0x8] ss:$16 sps:$4 sm:$0xff]   ;;  %3284 = vmatprep.subr.bf16.mxu1 %v4521_v2  ;;  %v4525_v5 = vld [vmem:[%s5587_s26 + $0x24] ss:$16 sps:$4 sm:$0xff]   ;;  %v4527_v6 = vld [vmem:[%s5587_s26 + $0x2c] ss:$16 sps:$4 sm:$0xff]  }
  0x9b   : > { %3158 = vmatpush1.bf16.msra.mxu0 %v4523_v3  ;;  %3286 = vmatpush1.bf16.msra.mxu1 %v4524_v4  ;;  %v4529_v7 = vld [vmem:[%s5587_s26 + $0x20] ss:$16 sps:$4 sm:$0xff]   ;;  %v4530_v8 = vld [vmem:[%s5587_s26 + $0x28] ss:$16 sps:$4 sm:$0xff]   ;;  %v4531_v9 = vld [vmem:[%s5587_s26 + $0x44] ss:$16 sps:$4 sm:$0xff]  }
  0x9c   : > { %3160 = vmatprep.subr.bf16.mxu0 %v4525_v5  ;;  %3288 = vmatprep.subr.bf16.mxu1 %v4527_v6  ;;  %v4533_v10 = vld [vmem:[%s5587_s26 + $0x4c] ss:$16 sps:$4 sm:$0xff]   ;;  %v4535_v11 = vld [vmem:[%s5587_s26 + $0x40] ss:$16 sps:$4 sm:$0xff]   ;;  %v4536_v12 = vld [vmem:[%s5587_s26 + $0x48] ss:$16 sps:$4 sm:$0xff]  }
  0x9d   : > { %v4537_v13 = vld [vmem:[%s5587_s26 + $0x64] ss:$16 sps:$4 sm:$0xff]   ;;  %v4539_v14 = vld [vmem:[%s5587_s26 + $0x6c] ss:$16 sps:$4 sm:$0xff]   ;;  %v4541_v15 = vld [vmem:[%s5587_s26 + $0x60] ss:$16 sps:$4 sm:$0xff]  }
  0x9e   : > { %v4542_v16 = vld [vmem:[%s5587_s26 + $0x68] ss:$16 sps:$4 sm:$0xff]   ;;  %v4543_v17 = vld [vmem:[%s5587_s26 + $0x84] ss:$16 sps:$4 sm:$0xff]   ;;  %v4545_v18 = vld [vmem:[%s5587_s26 + $0x8c] ss:$16 sps:$4 sm:$0xff]  }
  0x9f   : > { %3162 = vmatpush1.bf16.msra.mxu0 %v4529_v7  ;;  %3290 = vmatpush1.bf16.msra.mxu1 %v4530_v8  ;;  %v4547_v19 = vld [vmem:[%s5587_s26 + $0x80] ss:$16 sps:$4 sm:$0xff]   ;;  %v4548_v20 = vld [vmem:[%s5587_s26 + $0x88] ss:$16 sps:$4 sm:$0xff]   ;;  %v4549_v21 = vld [vmem:[%s5587_s26 + $0xa4] ss:$16 sps:$4 sm:$0xff]  }
  0xa0   : > { %3164 = vmatprep.subr.bf16.mxu0 %v4531_v9  ;;  %3292 = vmatprep.subr.bf16.mxu1 %v4533_v10  ;;  %v4551_v22 = vld [vmem:[%s5587_s26 + $0xac] ss:$16 sps:$4 sm:$0xff]   ;;  %v4553_v23 = vld [vmem:[%s5587_s26 + $0xa0] ss:$16 sps:$4 sm:$0xff]   ;;  %v4554_v24 = vld [vmem:[%s5587_s26 + $0xa8] ss:$16 sps:$4 sm:$0xff]  }
  0xa1   : > { %v4555_v25 = vld [vmem:[%s5587_s26 + $0xc4] ss:$16 sps:$4 sm:$0xff]   ;;  %v4557_v26 = vld [vmem:[%s5587_s26 + $0xcc] ss:$16 sps:$4 sm:$0xff]   ;;  %v4559_v27 = vld [vmem:[%s5587_s26 + $0xc0] ss:$16 sps:$4 sm:$0xff]  }
  0xa2   : > { %v4560_v28 = vld [vmem:[%s5587_s26 + $0xc8] ss:$16 sps:$4 sm:$0xff]   ;;  %v4561_v29 = vld [vmem:[%s5587_s26 + $0xe4] ss:$16 sps:$4 sm:$0xff]   ;;  %v4563_v30 = vld [vmem:[%s5587_s26 + $0xec] ss:$16 sps:$4 sm:$0xff]  }
  0xa3   : > { %3166 = vmatpush1.bf16.msra.mxu0 %v4535_v11  ;;  %3294 = vmatpush1.bf16.msra.mxu1 %v4536_v12  ;;  %v4565_v31 = vld [vmem:[%s5587_s26 + $0xe0] ss:$16 sps:$4 sm:$0xff]   ;;  %v4566_v32 = vld [vmem:[%s5587_s26 + $0xe8] ss:$16 sps:$4 sm:$0xff]   ;;  %v4567_v33 = vld [vmem:[%s5587_s26 + $0x104] ss:$16 sps:$4 sm:$0xff]  }
  0xa4   : > { %3168 = vmatprep.subr.bf16.mxu0 %v4537_v13  ;;  %3296 = vmatprep.subr.bf16.mxu1 %v4539_v14  ;;  %v4569_v34 = vld [vmem:[%s5587_s26 + $0x10c] ss:$16 sps:$4 sm:$0xff]   ;;  %v4571_v35 = vld [vmem:[%s5587_s26 + $0x100] ss:$16 sps:$4 sm:$0xff]   ;;  %v4572_v36 = vld [vmem:[%s5587_s26 + $0x108] ss:$16 sps:$4 sm:$0xff]  }
  0xa5   : > { %v4573_v37 = vld [vmem:[%s5587_s26 + $0x124] ss:$16 sps:$4 sm:$0xff]   ;;  %v4575_v38 = vld [vmem:[%s5587_s26 + $0x12c] ss:$16 sps:$4 sm:$0xff]   ;;  %v4577_v39 = vld [vmem:[%s5587_s26 + $0x120] ss:$16 sps:$4 sm:$0xff]  }
  0xa6   : > { %v4578_v40 = vld [vmem:[%s5587_s26 + $0x128] ss:$16 sps:$4 sm:$0xff]   ;;  %v4579_v41 = vld [vmem:[%s5587_s26 + $0x144] ss:$16 sps:$4 sm:$0xff]   ;;  %v4581_v42 = vld [vmem:[%s5587_s26 + $0x14c] ss:$16 sps:$4 sm:$0xff]  }
  0xa7   : > { %3170 = vmatpush1.bf16.msra.mxu0 %v4541_v15  ;;  %3298 = vmatpush1.bf16.msra.mxu1 %v4542_v16  ;;  %v4583_v43 = vld [vmem:[%s5587_s26 + $0x140] ss:$16 sps:$4 sm:$0xff]   ;;  %v4584_v44 = vld [vmem:[%s5587_s26 + $0x148] ss:$16 sps:$4 sm:$0xff]   ;;  %v4585_v45 = vld [vmem:[%s5587_s26 + $0x164] ss:$16 sps:$4 sm:$0xff]  }
  0xa8   : > { %3172 = vmatprep.subr.bf16.mxu0 %v4543_v17  ;;  %3300 = vmatprep.subr.bf16.mxu1 %v4545_v18  ;;  %v4587_v46 = vld [vmem:[%s5587_s26 + $0x16c] ss:$16 sps:$4 sm:$0xff]   ;;  %v4589_v48 = vld [vmem:[%s5587_s26 + $0x160] ss:$16 sps:$4 sm:$0xff]   ;;  %v4590_v49 = vld [vmem:[%s5587_s26 + $0x168] ss:$16 sps:$4 sm:$0xff]  }
  0xa9   : > { %v416_v47 = vld [vmem:[%s5608_s27 + $0x8] sm:$0xff]  ;;  %v4591_v50 = vld [vmem:[%s5587_s26 + $0x184] ss:$16 sps:$4 sm:$0xff]   ;;  %v4595_v52 = vld [vmem:[%s5587_s26 + $0x180] ss:$16 sps:$4 sm:$0xff]   ;;  %p2918_p13 = scmp.ne.s32.totalorder %s5291_s11, 1 }
  0xaa   : > { %867 = vmatprep.mubr.f32.mxu0 %v416_v47  ;;  %1009 = vmatprep.mubr.f32.mxu1 %v416_v47  ;;  %v4593_v51 = vld [vmem:[%s5587_s26 + $0x18c] ss:$16 sps:$4 sm:$0xff]   ;;  %v4596_v53 = vld [vmem:[%s5587_s26 + $0x188] ss:$16 sps:$4 sm:$0xff]   ;;  %v4597_v54 = vld [vmem:[%s5587_s26 + $0x1a4] ss:$16 sps:$4 sm:$0xff]  }
  0xab   : > { %3174 = vmatpush1.bf16.msra.mxu0 %v4547_v19  ;;  %3302 = vmatpush1.bf16.msra.mxu1 %v4548_v20  ;;  %v4599_v55 = vld [vmem:[%s5587_s26 + $0x1ac] ss:$16 sps:$4 sm:$0xff]   ;;  %v4601_v56 = vld [vmem:[%s5587_s26 + $0x1a0] ss:$16 sps:$4 sm:$0xff]   ;;  %v4602_v57 = vld [vmem:[%s5587_s26 + $0x1a8] ss:$16 sps:$4 sm:$0xff]  }
  0xac   : > { %3176 = vmatprep.subr.bf16.mxu0 %v4549_v21  ;;  %3304 = vmatprep.subr.bf16.mxu1 %v4551_v22  ;;  %v4603_v58 = vld [vmem:[%s5587_s26 + $0x1c4] ss:$16 sps:$4 sm:$0xff]   ;;  %v4605_v59 = vld [vmem:[%s5587_s26 + $0x1cc] ss:$16 sps:$4 sm:$0xff]   ;;  %v4607_v60 = vld [vmem:[%s5587_s26 + $0x1c0] ss:$16 sps:$4 sm:$0xff]  }
  0xad   : > { %v4608_v61 = vld [vmem:[%s5587_s26 + $0x1c8] ss:$16 sps:$4 sm:$0xff]   ;;  %v4609_v62 = vld [vmem:[%s5587_s26 + $0x1e4] ss:$16 sps:$4 sm:$0xff]   ;;  %v4611_v63 = vld [vmem:[%s5587_s26 + $0x1ec] ss:$16 sps:$4 sm:$0xff]  }
  0xae   : > { %v4613_v0 = vld [vmem:[%s5587_s26 + $0x1e0] ss:$16 sps:$4 sm:$0xff]   ;;  %v4614_v1 = vld [vmem:[%s5587_s26 + $0x1e8] ss:$16 sps:$4 sm:$0xff]   ;;  %v4615_v2 = vld [vmem:[%s5587_s26 + $0x204] ss:$16 sps:$4 sm:$0xff]  }
  0xaf   : > { %3178 = vmatpush1.bf16.msra.mxu0 %v4553_v23  ;;  %3306 = vmatpush1.bf16.msra.mxu1 %v4554_v24  ;;  %v4618_v3 = vld [vmem:[%s5587_s26 + $0x20c] ss:$16 sps:$4 sm:$0xff]   ;;  %v4617_v4 = vld [vmem:[%s5587_s26 + $0x200] ss:$16 sps:$4 sm:$0xff]   ;;  %v4620_v5 = vld [vmem:[%s5587_s26 + $0x208] ss:$16 sps:$4 sm:$0xff]  }
  0xb0   : > { %3180 = vmatprep.subr.bf16.mxu0 %v4555_v25  ;;  %3308 = vmatprep.subr.bf16.mxu1 %v4557_v26  ;;  %v415_v6 = vld [vmem:[%s5608_s27] sm:$0xff]  ;;  %v4624_v8 = vld [vmem:[%s5587_s26 + $0x22c] ss:$16 sps:$4 sm:$0xff]   ;;  %v4626_v10 = vld [vmem:[%s5587_s26 + $0x228] ss:$16 sps:$4 sm:$0xff]   ;;  %s6281_s3 = sld [smem:[#allocation16_spill]] (!%p2918_p13) }
  0xb1   : > { %v4621_v7 = vld [vmem:[%s5587_s26 + $0x224] ss:$16 sps:$4 sm:$0xff]   ;;  %v4623_v9 = vld [vmem:[%s5587_s26 + $0x220] ss:$16 sps:$4 sm:$0xff]   ;;  %v4630_v12 = vld [vmem:[%s5587_s26 + $0x24c] ss:$16 sps:$4 sm:$0xff]  }
  0xb2   : > { %v4627_v11 = vld [vmem:[%s5587_s26 + $0x244] ss:$16 sps:$4 sm:$0xff]   ;;  %v4629_v13 = vld [vmem:[%s5587_s26 + $0x240] ss:$16 sps:$4 sm:$0xff]   ;;  %v4632_v14 = vld [vmem:[%s5587_s26 + $0x248] ss:$16 sps:$4 sm:$0xff]  }
  0xb3   : > { %3182 = vmatpush1.bf16.msra.mxu0 %v4559_v27  ;;  %3310 = vmatpush1.bf16.msra.mxu1 %v4560_v28  ;;  %v4633_v15 = vld [vmem:[%s5587_s26 + $0x264] ss:$16 sps:$4 sm:$0xff]   ;;  %v4636_v16 = vld [vmem:[%s5587_s26 + $0x26c] ss:$16 sps:$4 sm:$0xff]   ;;  %v4635_v17 = vld [vmem:[%s5587_s26 + $0x260] ss:$16 sps:$4 sm:$0xff]  }
  0xb4   : > { %3184 = vmatprep.subr.bf16.mxu0 %v4561_v29  ;;  %3312 = vmatprep.subr.bf16.mxu1 %v4563_v30  ;;  %v4638_v18 = vld [vmem:[%s5587_s26 + $0x268] ss:$16 sps:$4 sm:$0xff]   ;;  %v4639_v19 = vld [vmem:[%s5587_s26 + $0x284] ss:$16 sps:$4 sm:$0xff]   ;;  %v4642_v20 = vld [vmem:[%s5587_s26 + $0x28c] ss:$16 sps:$4 sm:$0xff]  }
  0xb5   : > { %v4641_v21 = vld [vmem:[%s5587_s26 + $0x280] ss:$16 sps:$4 sm:$0xff]   ;;  %v4644_v22 = vld [vmem:[%s5587_s26 + $0x288] ss:$16 sps:$4 sm:$0xff]   ;;  %v4645_v23 = vld [vmem:[%s5587_s26 + $0x2a4] ss:$16 sps:$4 sm:$0xff]  }
  0xb6   : > { %v4648_v24 = vld [vmem:[%s5587_s26 + $0x2ac] ss:$16 sps:$4 sm:$0xff]   ;;  %v4647_v25 = vld [vmem:[%s5587_s26 + $0x2a0] ss:$16 sps:$4 sm:$0xff]   ;;  %v4650_v26 = vld [vmem:[%s5587_s26 + $0x2a8] ss:$16 sps:$4 sm:$0xff]  }
  0xb7   : > { %3186 = vmatpush1.bf16.msra.mxu0 %v4565_v31  ;;  %3314 = vmatpush1.bf16.msra.mxu1 %v4566_v32  ;;  %v4651_v27 = vld [vmem:[%s5587_s26 + $0x2c4] ss:$16 sps:$4 sm:$0xff]   ;;  %v4654_v28 = vld [vmem:[%s5587_s26 + $0x2cc] ss:$16 sps:$4 sm:$0xff]   ;;  %v4653_v30 = vld [vmem:[%s5587_s26 + $0x2c0] ss:$16 sps:$4 sm:$0xff]  }
  0xb8   : > { %3188 = vmatprep.subr.bf16.mxu0 %v4567_v33  ;;  %3316 = vmatprep.subr.bf16.mxu1 %v4569_v34  ;;  %v418_v29 = vld [vmem:[%s5608_s27 + $0x18] sm:$0xff]  ;;  %v4657_v32 = vld [vmem:[%s5587_s26 + $0x2e4] ss:$16 sps:$4 sm:$0xff]   ;;  %v4659_v34 = vld [vmem:[%s5587_s26 + $0x2e0] ss:$16 sps:$4 sm:$0xff]   ;;  %s6282_s7 = sld [smem:[#allocation18_spill]] (!%p2918_p13) }
  0xb9   : > { %v4656_v31 = vld [vmem:[%s5587_s26 + $0x2c8] ss:$16 sps:$4 sm:$0xff]   ;;  %v4660_v33 = vld [vmem:[%s5587_s26 + $0x2ec] ss:$16 sps:$4 sm:$0xff]   ;;  %s6283_s6 = sld [smem:[#allocation20_spill]] (!%p2918_p13) }
  0xba   : > { %v4680_v47 = vld [vmem:[%s5587_s26 + $0x348] ss:$16 sps:$4 sm:$0xff]  }
  0xbb   : > { %3190 = vmatpush1.bf16.msra.mxu0 %v4571_v35  ;;  %3318 = vmatpush1.bf16.msra.mxu1 %v4572_v36  ;;  %v4662_v35 = vld [vmem:[%s5587_s26 + $0x2e8] ss:$16 sps:$4 sm:$0xff]   ;;  %v4663_v36 = vld [vmem:[%s5587_s26 + $0x304] ss:$16 sps:$4 sm:$0xff]  }
  0xbc   : > { %3192 = vmatprep.subr.bf16.mxu0 %v4573_v37  ;;  %3320 = vmatprep.subr.bf16.mxu1 %v4575_v38  ;;  %v4666_v37 = vld [vmem:[%s5587_s26 + $0x30c] ss:$16 sps:$4 sm:$0xff]   ;;  %v4665_v38 = vld [vmem:[%s5587_s26 + $0x300] ss:$16 sps:$4 sm:$0xff]  }
  0xbf   : > { %3194 = vmatpush1.bf16.msra.mxu0 %v4577_v39  ;;  %3322 = vmatpush1.bf16.msra.mxu1 %v4578_v40  ;;  %v4668_v39 = vld [vmem:[%s5587_s26 + $0x308] ss:$16 sps:$4 sm:$0xff]   ;;  %v4669_v40 = vld [vmem:[%s5587_s26 + $0x324] ss:$16 sps:$4 sm:$0xff]  }
  0xc0   : > { %3196 = vmatprep.subr.bf16.mxu0 %v4579_v41  ;;  %3324 = vmatprep.subr.bf16.mxu1 %v4581_v42  ;;  %v4672_v41 = vld [vmem:[%s5587_s26 + $0x32c] ss:$16 sps:$4 sm:$0xff]   ;;  %v4671_v42 = vld [vmem:[%s5587_s26 + $0x320] ss:$16 sps:$4 sm:$0xff]  }
  0xc3   : > { %3198 = vmatpush1.bf16.msra.mxu0 %v4583_v43  ;;  %3326 = vmatpush1.bf16.msra.mxu1 %v4584_v44  ;;  %v4674_v43 = vld [vmem:[%s5587_s26 + $0x328] ss:$16 sps:$4 sm:$0xff]   ;;  %v4675_v44 = vld [vmem:[%s5587_s26 + $0x344] ss:$16 sps:$4 sm:$0xff]  }
  0xc4   : > { %3200 = vmatprep.subr.bf16.mxu0 %v4585_v45  ;;  %3328 = vmatprep.subr.bf16.mxu1 %v4587_v46  ;;  %v4678_v45 = vld [vmem:[%s5587_s26 + $0x34c] ss:$16 sps:$4 sm:$0xff]   ;;  %v4677_v46 = vld [vmem:[%s5587_s26 + $0x340] ss:$16 sps:$4 sm:$0xff]  }
  0xc7   : > { %3202 = vmatpush1.bf16.msra.mxu0 %v4589_v48  ;;  %3330 = vmatpush1.bf16.msra.mxu1 %v4590_v49  ;;  %v4681_v48 = vld [vmem:[%s5587_s26 + $0x364] ss:$16 sps:$4 sm:$0xff]   ;;  %v4684_v49 = vld [vmem:[%s5587_s26 + $0x36c] ss:$16 sps:$4 sm:$0xff]  }
  0xc8   : > { %3204 = vmatprep.subr.bf16.mxu0 %v4591_v50  ;;  %3332 = vmatprep.subr.bf16.mxu1 %v4593_v51  ;;  %v4683_v50 = vld [vmem:[%s5587_s26 + $0x360] ss:$16 sps:$4 sm:$0xff]   ;;  %v4686_v51 = vld [vmem:[%s5587_s26 + $0x368] ss:$16 sps:$4 sm:$0xff]  }
  0xcb   : > { %3206 = vmatpush1.bf16.msra.mxu0 %v4595_v52  ;;  %3334 = vmatpush1.bf16.msra.mxu1 %v4596_v53  ;;  %v4687_v52 = vld [vmem:[%s5587_s26 + $0x384] ss:$16 sps:$4 sm:$0xff]   ;;  %v4690_v53 = vld [vmem:[%s5587_s26 + $0x38c] ss:$16 sps:$4 sm:$0xff]  }
  0xcc   : > { %3208 = vmatprep.subr.bf16.mxu0 %v4597_v54  ;;  %3336 = vmatprep.subr.bf16.mxu1 %v4599_v55  ;;  %v4689_v54 = vld [vmem:[%s5587_s26 + $0x380] ss:$16 sps:$4 sm:$0xff]   ;;  %v4692_v55 = vld [vmem:[%s5587_s26 + $0x388] ss:$16 sps:$4 sm:$0xff]  }
  0xcf   : > { %3210 = vmatpush1.bf16.msra.mxu0 %v4601_v56  ;;  %3338 = vmatpush1.bf16.msra.mxu1 %v4602_v57  ;;  %v4693_v56 = vld [vmem:[%s5587_s26 + $0x3a4] ss:$16 sps:$4 sm:$0xff]   ;;  %v4696_v57 = vld [vmem:[%s5587_s26 + $0x3ac] ss:$16 sps:$4 sm:$0xff]  }
  0xd0   : > { %3212 = vmatprep.subr.bf16.mxu0 %v4603_v58  ;;  %3340 = vmatprep.subr.bf16.mxu1 %v4605_v59  ;;  %v4695_v58 = vld [vmem:[%s5587_s26 + $0x3a0] ss:$16 sps:$4 sm:$0xff]   ;;  %v4698_v59 = vld [vmem:[%s5587_s26 + $0x3a8] ss:$16 sps:$4 sm:$0xff]  }
  0xd3   : > { %3214 = vmatpush1.bf16.msra.mxu0 %v4607_v60  ;;  %3342 = vmatpush1.bf16.msra.mxu1 %v4608_v61  ;;  %v4699_v60 = vld [vmem:[%s5587_s26 + $0x3c4] ss:$16 sps:$4 sm:$0xff]   ;;  %v4702_v61 = vld [vmem:[%s5587_s26 + $0x3cc] ss:$16 sps:$4 sm:$0xff]  }
  0xd4   : > { %3216 = vmatprep.subr.bf16.mxu0 %v4609_v62  ;;  %3344 = vmatprep.subr.bf16.mxu1 %v4611_v63  ;;  %v4701_v62 = vld [vmem:[%s5587_s26 + $0x3c0] ss:$16 sps:$4 sm:$0xff]   ;;  %v4704_v63 = vld [vmem:[%s5587_s26 + $0x3c8] ss:$16 sps:$4 sm:$0xff]  }
  0xd7   : > { %3218 = vmatpush1.bf16.msra.mxu0 %v4613_v0  ;;  %3346 = vmatpush1.bf16.msra.mxu1 %v4614_v1  ;;  %v4705_v0 = vld [vmem:[%s5587_s26 + $0x3e4] ss:$16 sps:$4 sm:$0xff]   ;;  %v4708_v1 = vld [vmem:[%s5587_s26 + $0x3ec] ss:$16 sps:$4 sm:$0xff]  }
  0xd8   : > { %3220 = vmatprep.subr.bf16.mxu0 %v4615_v2  ;;  %3348 = vmatprep.subr.bf16.mxu1 %v4618_v3  ;;  %v4707_v2 = vld [vmem:[%s5587_s26 + $0x3e0] ss:$16 sps:$4 sm:$0xff]   ;;  %v4710_v3 = vld [vmem:[%s5587_s26 + $0x3e8] ss:$16 sps:$4 sm:$0xff]  }
  0xda   : > { %868 = vmatmul.mubr.f32.vlgmr.msra.gmra.mrb[0].mxu0 %v415_v6  ;;  %1010 = vmatmul.mubr.f32.vlgmr.msra.gmra.mrb[0].mxu1 %v415_v6  ;;  %v413_v6 = vld [vmem:[#allocation2 + $0x10] sm:$0xff] }
  0xdb   : > { %3222 = vmatpush1.bf16.msra.mxu0 %v4617_v4  ;;  %3350 = vmatpush1.bf16.msra.mxu1 %v4620_v5  ;;  %v417_v4 = vld [vmem:[%s5608_s27 + $0x10] sm:$0xff]  ;;  %v411_v5 = vld [vmem:[#allocation2] sm:$0xff] }
  0xdc   : > { %3224 = vmatprep.subr.bf16.mxu0 %v4621_v7  ;;  %3352 = vmatprep.subr.bf16.mxu1 %v4624_v8  ;;  %v412_v7 = vld [vmem:[#allocation2 + $0x8] sm:$0xff]  ;;  %v414_v8 = vld [vmem:[#allocation2 + $0x18] sm:$0xff] }
  0xdd   : > { %938 = vmatprep.mubr.f32.mxu0 %v418_v29  ;;  %1080 = vmatprep.mubr.f32.mxu1 %v418_v29  ;;  %v4729_v29 = vld [vmem:[%s6237_s2 + $0x64] ss:$16 sps:$4 sm:$0xff] (!%p2918_p13)  }
  0xdf   : > { %3226 = vmatpush1.bf16.msra.mxu0 %v4623_v9  ;;  %3354 = vmatpush1.bf16.msra.mxu1 %v4626_v10 }
  0xe0   : > { %3228 = vmatprep.subr.bf16.mxu0 %v4627_v11  ;;  %3356 = vmatprep.subr.bf16.mxu1 %v4630_v12 }
  0xe3   : > { %3230 = vmatpush1.bf16.msra.mxu0 %v4629_v13  ;;  %3358 = vmatpush1.bf16.msra.mxu1 %v4632_v14 }
  0xe4   : > { %3232 = vmatprep.subr.bf16.mxu0 %v4633_v15  ;;  %3360 = vmatprep.subr.bf16.mxu1 %v4636_v16 }
  0xe7   : > { %3234 = vmatpush1.bf16.msra.mxu0 %v4635_v17  ;;  %3362 = vmatpush1.bf16.msra.mxu1 %v4638_v18  ;;  %v4711_v17 = vld [vmem:[%s6237_s2 + $0x4] ss:$16 sps:$4 sm:$0xff] (!%p2918_p13)   ;;  %v4713_v18 = vld [vmem:[%s6237_s2 + $0xc] ss:$16 sps:$4 sm:$0xff] (!%p2918_p13)  }
  0xe8   : > { %3236 = vmatprep.subr.bf16.mxu0 %v4639_v19  ;;  %3364 = vmatprep.subr.bf16.mxu1 %v4642_v20  ;;  %v4715_v19 = vld [vmem:[%s6237_s2] ss:$16 sps:$4 sm:$0xff] (!%p2918_p13)   ;;  %v4716_v20 = vld [vmem:[%s6237_s2 + $0x8] ss:$16 sps:$4 sm:$0xff] (!%p2918_p13)  }
  0xeb   : > { %3238 = vmatpush1.bf16.msra.mxu0 %v4641_v21  ;;  %3366 = vmatpush1.bf16.msra.mxu1 %v4644_v22  ;;  %v4717_v21 = vld [vmem:[%s6237_s2 + $0x24] ss:$16 sps:$4 sm:$0xff] (!%p2918_p13)   ;;  %v4719_v22 = vld [vmem:[%s6237_s2 + $0x2c] ss:$16 sps:$4 sm:$0xff] (!%p2918_p13)  }
  0xec   : > { %3240 = vmatprep.subr.bf16.mxu0 %v4645_v23  ;;  %3368 = vmatprep.subr.bf16.mxu1 %v4648_v24  ;;  %v4721_v23 = vld [vmem:[%s6237_s2 + $0x20] ss:$16 sps:$4 sm:$0xff] (!%p2918_p13)   ;;  %v4722_v24 = vld [vmem:[%s6237_s2 + $0x28] ss:$16 sps:$4 sm:$0xff] (!%p2918_p13)  }
  0xef   : > { %3242 = vmatpush1.bf16.msra.mxu0 %v4647_v25  ;;  %3370 = vmatpush1.bf16.msra.mxu1 %v4650_v26  ;;  %v4723_v25 = vld [vmem:[%s6237_s2 + $0x44] ss:$16 sps:$4 sm:$0xff] (!%p2918_p13)   ;;  %v4725_v26 = vld [vmem:[%s6237_s2 + $0x4c] ss:$16 sps:$4 sm:$0xff] (!%p2918_p13)  }
  0xf0   : > { %3244 = vmatprep.subr.bf16.mxu0 %v4651_v27  ;;  %3372 = vmatprep.subr.bf16.mxu1 %v4654_v28  ;;  %v4727_v27 = vld [vmem:[%s6237_s2 + $0x40] ss:$16 sps:$4 sm:$0xff] (!%p2918_p13)   ;;  %v4728_v28 = vld [vmem:[%s6237_s2 + $0x48] ss:$16 sps:$4 sm:$0xff] (!%p2918_p13)  }
  0xf3   : > { %3246 = vmatpush1.bf16.msra.mxu0 %v4653_v30  ;;  %3374 = vmatpush1.bf16.msra.mxu1 %v4656_v31  ;;  %v4731_v30 = vld [vmem:[%s6237_s2 + $0x6c] ss:$16 sps:$4 sm:$0xff] (!%p2918_p13)   ;;  %v4733_v31 = vld [vmem:[%s6237_s2 + $0x60] ss:$16 sps:$4 sm:$0xff] (!%p2918_p13)  }
  0xf4   : > { %3248 = vmatprep.subr.bf16.mxu0 %v4657_v32  ;;  %3376 = vmatprep.subr.bf16.mxu1 %v4660_v33  ;;  %v4734_v32 = vld [vmem:[%s6237_s2 + $0x68] ss:$16 sps:$4 sm:$0xff] (!%p2918_p13)   ;;  %v4735_v33 = vld [vmem:[%s6237_s2 + $0x84] ss:$16 sps:$4 sm:$0xff] (!%p2918_p13)  }
  0xf7   : > { %3250 = vmatpush1.bf16.msra.mxu0 %v4659_v34  ;;  %3378 = vmatpush1.bf16.msra.mxu1 %v4662_v35  ;;  %v4737_v34 = vld [vmem:[%s6237_s2 + $0x8c] ss:$16 sps:$4 sm:$0xff] (!%p2918_p13)   ;;  %v4739_v35 = vld [vmem:[%s6237_s2 + $0x80] ss:$16 sps:$4 sm:$0xff] (!%p2918_p13)  }
  0xf8   : > { %3252 = vmatprep.subr.bf16.mxu0 %v4663_v36  ;;  %3380 = vmatprep.subr.bf16.mxu1 %v4666_v37  ;;  %v4740_v36 = vld [vmem:[%s6237_s2 + $0x88] ss:$16 sps:$4 sm:$0xff] (!%p2918_p13)   ;;  %v4741_v37 = vld [vmem:[%s6237_s2 + $0xa4] ss:$16 sps:$4 sm:$0xff] (!%p2918_p13)  }
  0xfb   : > { %3254 = vmatpush1.bf16.msra.mxu0 %v4665_v38  ;;  %3382 = vmatpush1.bf16.msra.mxu1 %v4668_v39  ;;  %v4743_v38 = vld [vmem:[%s6237_s2 + $0xac] ss:$16 sps:$4 sm:$0xff] (!%p2918_p13)   ;;  %v4745_v39 = vld [vmem:[%s6237_s2 + $0xa0] ss:$16 sps:$4 sm:$0xff] (!%p2918_p13)  }
  0xfc   : > { %3256 = vmatprep.subr.bf16.mxu0 %v4669_v40  ;;  %3384 = vmatprep.subr.bf16.mxu1 %v4672_v41  ;;  %v4746_v40 = vld [vmem:[%s6237_s2 + $0xa8] ss:$16 sps:$4 sm:$0xff] (!%p2918_p13)   ;;  %v4747_v41 = vld [vmem:[%s6237_s2 + $0xc4] ss:$16 sps:$4 sm:$0xff] (!%p2918_p13)  }
  0xff   : > { %3258 = vmatpush1.bf16.msra.mxu0 %v4671_v42  ;;  %3386 = vmatpush1.bf16.msra.mxu1 %v4674_v43  ;;  %v4749_v42 = vld [vmem:[%s6237_s2 + $0xcc] ss:$16 sps:$4 sm:$0xff] (!%p2918_p13)   ;;  %v4751_v43 = vld [vmem:[%s6237_s2 + $0xc0] ss:$16 sps:$4 sm:$0xff] (!%p2918_p13)  }
 0x100   : > { %3260 = vmatprep.subr.bf16.mxu0 %v4675_v44  ;;  %3388 = vmatprep.subr.bf16.mxu1 %v4678_v45  ;;  %v4752_v44 = vld [vmem:[%s6237_s2 + $0xc8] ss:$16 sps:$4 sm:$0xff] (!%p2918_p13)   ;;  %v4753_v45 = vld [vmem:[%s6237_s2 + $0xe4] ss:$16 sps:$4 sm:$0xff] (!%p2918_p13)  }
 0x103   : > { %3262 = vmatpush1.bf16.msra.mxu0 %v4677_v46  ;;  %3390 = vmatpush1.bf16.msra.mxu1 %v4680_v47  ;;  %v4755_v46 = vld [vmem:[%s6237_s2 + $0xec] ss:$16 sps:$4 sm:$0xff] (!%p2918_p13)   ;;  %v4757_v47 = vld [vmem:[%s6237_s2 + $0xe0] ss:$16 sps:$4 sm:$0xff] (!%p2918_p13)  }
 0x104   : > { %3264 = vmatprep.subr.bf16.mxu0 %v4681_v48  ;;  %3392 = vmatprep.subr.bf16.mxu1 %v4684_v49  ;;  %v4758_v48 = vld [vmem:[%s6237_s2 + $0xe8] ss:$16 sps:$4 sm:$0xff] (!%p2918_p13)   ;;  %v4759_v49 = vld [vmem:[%s6237_s2 + $0x104] ss:$16 sps:$4 sm:$0xff] (!%p2918_p13)  }
 0x107   : > { %3266 = vmatpush1.bf16.msra.mxu0 %v4683_v50  ;;  %3394 = vmatpush1.bf16.msra.mxu1 %v4686_v51  ;;  %v4761_v50 = vld [vmem:[%s6237_s2 + $0x10c] ss:$16 sps:$4 sm:$0xff] (!%p2918_p13)   ;;  %v4763_v51 = vld [vmem:[%s6237_s2 + $0x100] ss:$16 sps:$4 sm:$0xff] (!%p2918_p13)  }
 0x108   : > { %3268 = vmatprep.subr.bf16.mxu0 %v4687_v52  ;;  %3396 = vmatprep.subr.bf16.mxu1 %v4690_v53  ;;  %v4764_v52 = vld [vmem:[%s6237_s2 + $0x108] ss:$16 sps:$4 sm:$0xff] (!%p2918_p13)   ;;  %v4765_v53 = vld [vmem:[%s6237_s2 + $0x124] ss:$16 sps:$4 sm:$0xff] (!%p2918_p13)  }
 0x10b   : > { %3270 = vmatpush1.bf16.msra.mxu0 %v4689_v54  ;;  %3398 = vmatpush1.bf16.msra.mxu1 %v4692_v55  ;;  %v4767_v54 = vld [vmem:[%s6237_s2 + $0x12c] ss:$16 sps:$4 sm:$0xff] (!%p2918_p13)   ;;  %v4769_v55 = vld [vmem:[%s6237_s2 + $0x120] ss:$16 sps:$4 sm:$0xff] (!%p2918_p13)  }
 0x10c   : > { %3272 = vmatprep.subr.bf16.mxu0 %v4693_v56  ;;  %3400 = vmatprep.subr.bf16.mxu1 %v4696_v57  ;;  %v4770_v56 = vld [vmem:[%s6237_s2 + $0x128] ss:$16 sps:$4 sm:$0xff] (!%p2918_p13)   ;;  %v4771_v57 = vld [vmem:[%s6237_s2 + $0x144] ss:$16 sps:$4 sm:$0xff] (!%p2918_p13)  }
 0x10f   : > { %3274 = vmatpush1.bf16.msra.mxu0 %v4695_v58  ;;  %3402 = vmatpush1.bf16.msra.mxu1 %v4698_v59  ;;  %v4773_v58 = vld [vmem:[%s6237_s2 + $0x14c] ss:$16 sps:$4 sm:$0xff] (!%p2918_p13)   ;;  %v4775_v59 = vld [vmem:[%s6237_s2 + $0x140] ss:$16 sps:$4 sm:$0xff] (!%p2918_p13)  }
 0x110   : > { %3276 = vmatprep.subr.bf16.mxu0 %v4699_v60  ;;  %3404 = vmatprep.subr.bf16.mxu1 %v4702_v61  ;;  %v4776_v60 = vld [vmem:[%s6237_s2 + $0x148] ss:$16 sps:$4 sm:$0xff] (!%p2918_p13)   ;;  %v4777_v61 = vld [vmem:[%s6237_s2 + $0x164] ss:$16 sps:$4 sm:$0xff] (!%p2918_p13)  }
 0x113   : > { %3278 = vmatpush1.bf16.msra.mxu0 %v4701_v62  ;;  %3406 = vmatpush1.bf16.msra.mxu1 %v4704_v63  ;;  %v4779_v62 = vld [vmem:[%s6237_s2 + $0x16c] ss:$16 sps:$4 sm:$0xff] (!%p2918_p13)  }
 0x114   : > { %3280 = vmatprep.subr.bf16.mxu0 %v4705_v0  ;;  %3408 = vmatprep.subr.bf16.mxu1 %v4708_v1  ;;  %v4781_v0 = vld [vmem:[%s6237_s2 + $0x160] ss:$16 sps:$4 sm:$0xff] (!%p2918_p13)   ;;  %v4782_v1 = vld [vmem:[%s6237_s2 + $0x168] ss:$16 sps:$4 sm:$0xff] (!%p2918_p13)  }
 0x117   : > { %3282 = vmatpush1.bf16.msra.mxu0 %v4707_v2  ;;  %3410 = vmatpush1.bf16.msra.mxu1 %v4710_v3  ;;  %v4783_v2 = vld [vmem:[%s6237_s2 + $0x184] ss:$16 sps:$4 sm:$0xff] (!%p2918_p13)   ;;  %v4785_v3 = vld [vmem:[%s6237_s2 + $0x18c] ss:$16 sps:$4 sm:$0xff] (!%p2918_p13)  }
 0x118   : > { %3412 = vmatprep.subr.bf16.mxu0 (!%p2918_p13), %v4711_v17  ;;  %3540 = vmatprep.subr.bf16.mxu1 (!%p2918_p13), %v4713_v18  ;;  %v4806_v17 = vld [vmem:[%s6237_s2 + $0x1e8] ss:$16 sps:$4 sm:$0xff] (!%p2918_p13)   ;;  %v4807_v18 = vld [vmem:[%s6237_s2 + $0x204] ss:$16 sps:$4 sm:$0xff] (!%p2918_p13)  }
 0x11a   : > { %939 = vmatmul.mubr.f32.vlgmr.msra.gmra.mrb[0].mxu0 %v417_v4  ;;  %1081 = vmatmul.mubr.f32.vlgmr.msra.gmra.mrb[0].mxu1 %v417_v4  ;;  %v4787_v4 = vld [vmem:[%s6237_s2 + $0x180] ss:$16 sps:$4 sm:$0xff] (!%p2918_p13)  }
 0x11b   : > { %3414 = vmatpush1.bf16.msra.mxu0 (!%p2918_p13), %v4715_v19  ;;  %3542 = vmatpush1.bf16.msra.mxu1 (!%p2918_p13), %v4716_v20  ;;  %v4810_v19 = vld [vmem:[%s6237_s2 + $0x20c] ss:$16 sps:$4 sm:$0xff] (!%p2918_p13)   ;;  %v4809_v20 = vld [vmem:[%s6237_s2 + $0x200] ss:$16 sps:$4 sm:$0xff] (!%p2918_p13)  }
 0x11c   : > { %3416 = vmatprep.subr.bf16.mxu0 (!%p2918_p13), %v4717_v21  ;;  %3544 = vmatprep.subr.bf16.mxu1 (!%p2918_p13), %v4719_v22  ;;  %v4812_v21 = vld [vmem:[%s6237_s2 + $0x208] ss:$16 sps:$4 sm:$0xff] (!%p2918_p13)  }
 0x11f   : > { %3418 = vmatpush1.bf16.msra.mxu0 (!%p2918_p13), %v4721_v23  ;;  %3546 = vmatpush1.bf16.msra.mxu1 (!%p2918_p13), %v4722_v24  ;;  %v4813_v23 = vld [vmem:[%s6237_s2 + $0x224] ss:$16 sps:$4 sm:$0xff] (!%p2918_p13)   ;;  %v4816_v24 = vld [vmem:[%s6237_s2 + $0x22c] ss:$16 sps:$4 sm:$0xff] (!%p2918_p13)  }
 0x120   : > { %3420 = vmatprep.subr.bf16.mxu0 (!%p2918_p13), %v4723_v25  ;;  %3548 = vmatprep.subr.bf16.mxu1 (!%p2918_p13), %v4725_v26  ;;  %v4815_v25 = vld [vmem:[%s6237_s2 + $0x220] ss:$16 sps:$4 sm:$0xff] (!%p2918_p13)   ;;  %v4818_v26 = vld [vmem:[%s6237_s2 + $0x228] ss:$16 sps:$4 sm:$0xff] (!%p2918_p13)  }
 0x123   : > { %3422 = vmatpush1.bf16.msra.mxu0 (!%p2918_p13), %v4727_v27  ;;  %3550 = vmatpush1.bf16.msra.mxu1 (!%p2918_p13), %v4728_v28  ;;  %v4819_v27 = vld [vmem:[%s6237_s2 + $0x244] ss:$16 sps:$4 sm:$0xff] (!%p2918_p13)   ;;  %v4822_v28 = vld [vmem:[%s6237_s2 + $0x24c] ss:$16 sps:$4 sm:$0xff] (!%p2918_p13)  }
 0x124   : > { %3424 = vmatprep.subr.bf16.mxu0 (!%p2918_p13), %v4729_v29  ;;  %3552 = vmatprep.subr.bf16.mxu1 (!%p2918_p13), %v4731_v30  ;;  %v4821_v29 = vld [vmem:[%s6237_s2 + $0x240] ss:$16 sps:$4 sm:$0xff] (!%p2918_p13)   ;;  %v4824_v30 = vld [vmem:[%s6237_s2 + $0x248] ss:$16 sps:$4 sm:$0xff] (!%p2918_p13)  }
 0x127   : > { %3426 = vmatpush1.bf16.msra.mxu0 (!%p2918_p13), %v4733_v31  ;;  %3554 = vmatpush1.bf16.msra.mxu1 (!%p2918_p13), %v4734_v32  ;;  %v4825_v31 = vld [vmem:[%s6237_s2 + $0x264] ss:$16 sps:$4 sm:$0xff] (!%p2918_p13)   ;;  %v4828_v32 = vld [vmem:[%s6237_s2 + $0x26c] ss:$16 sps:$4 sm:$0xff] (!%p2918_p13)  }
 0x128   : > { %3428 = vmatprep.subr.bf16.mxu0 (!%p2918_p13), %v4735_v33  ;;  %3556 = vmatprep.subr.bf16.mxu1 (!%p2918_p13), %v4737_v34  ;;  %v4827_v33 = vld [vmem:[%s6237_s2 + $0x260] ss:$16 sps:$4 sm:$0xff] (!%p2918_p13)   ;;  %v4830_v34 = vld [vmem:[%s6237_s2 + $0x268] ss:$16 sps:$4 sm:$0xff] (!%p2918_p13)  }
 0x12b   : > { %3430 = vmatpush1.bf16.msra.mxu0 (!%p2918_p13), %v4739_v35  ;;  %3558 = vmatpush1.bf16.msra.mxu1 (!%p2918_p13), %v4740_v36  ;;  %v4831_v35 = vld [vmem:[%s6237_s2 + $0x284] ss:$16 sps:$4 sm:$0xff] (!%p2918_p13)   ;;  %v4834_v36 = vld [vmem:[%s6237_s2 + $0x28c] ss:$16 sps:$4 sm:$0xff] (!%p2918_p13)  }
 0x12c   : > { %3432 = vmatprep.subr.bf16.mxu0 (!%p2918_p13), %v4741_v37  ;;  %3560 = vmatprep.subr.bf16.mxu1 (!%p2918_p13), %v4743_v38  ;;  %v4833_v37 = vld [vmem:[%s6237_s2 + $0x280] ss:$16 sps:$4 sm:$0xff] (!%p2918_p13)   ;;  %v4836_v38 = vld [vmem:[%s6237_s2 + $0x288] ss:$16 sps:$4 sm:$0xff] (!%p2918_p13)  }
 0x12f   : > { %3434 = vmatpush1.bf16.msra.mxu0 (!%p2918_p13), %v4745_v39  ;;  %3562 = vmatpush1.bf16.msra.mxu1 (!%p2918_p13), %v4746_v40  ;;  %v4837_v39 = vld [vmem:[%s6237_s2 + $0x2a4] ss:$16 sps:$4 sm:$0xff] (!%p2918_p13)   ;;  %v4840_v40 = vld [vmem:[%s6237_s2 + $0x2ac] ss:$16 sps:$4 sm:$0xff] (!%p2918_p13)  }
 0x130   : > { %3436 = vmatprep.subr.bf16.mxu0 (!%p2918_p13), %v4747_v41  ;;  %3564 = vmatprep.subr.bf16.mxu1 (!%p2918_p13), %v4749_v42  ;;  %v4839_v41 = vld [vmem:[%s6237_s2 + $0x2a0] ss:$16 sps:$4 sm:$0xff] (!%p2918_p13)   ;;  %v4842_v42 = vld [vmem:[%s6237_s2 + $0x2a8] ss:$16 sps:$4 sm:$0xff] (!%p2918_p13)  }
 0x133   : > { %3438 = vmatpush1.bf16.msra.mxu0 (!%p2918_p13), %v4751_v43  ;;  %3566 = vmatpush1.bf16.msra.mxu1 (!%p2918_p13), %v4752_v44  ;;  %v4843_v43 = vld [vmem:[%s6237_s2 + $0x2c4] ss:$16 sps:$4 sm:$0xff] (!%p2918_p13)   ;;  %v4846_v44 = vld [vmem:[%s6237_s2 + $0x2cc] ss:$16 sps:$4 sm:$0xff] (!%p2918_p13)  }
 0x134   : > { %3440 = vmatprep.subr.bf16.mxu0 (!%p2918_p13), %v4753_v45  ;;  %3568 = vmatprep.subr.bf16.mxu1 (!%p2918_p13), %v4755_v46  ;;  %v4845_v46 = vld [vmem:[%s6237_s2 + $0x2c0] ss:$16 sps:$4 sm:$0xff] (!%p2918_p13)  }
 0x137   : > { %3442 = vmatpush1.bf16.msra.mxu0 (!%p2918_p13), %v4757_v47  ;;  %3570 = vmatpush1.bf16.msra.mxu1 (!%p2918_p13), %v4758_v48  ;;  %v4848_v47 = vld [vmem:[%s6237_s2 + $0x2c8] ss:$16 sps:$4 sm:$0xff] (!%p2918_p13)   ;;  %v4849_v48 = vld [vmem:[%s6237_s2 + $0x2e4] ss:$16 sps:$4 sm:$0xff] (!%p2918_p13)  }
 0x138   : > { %3444 = vmatprep.subr.bf16.mxu0 (!%p2918_p13), %v4759_v49  ;;  %3572 = vmatprep.subr.bf16.mxu1 (!%p2918_p13), %v4761_v50  ;;  %v4852_v49 = vld [vmem:[%s6237_s2 + $0x2ec] ss:$16 sps:$4 sm:$0xff] (!%p2918_p13)   ;;  %v4851_v50 = vld [vmem:[%s6237_s2 + $0x2e0] ss:$16 sps:$4 sm:$0xff] (!%p2918_p13)  }
 0x13b   : > { %3446 = vmatpush1.bf16.msra.mxu0 (!%p2918_p13), %v4763_v51  ;;  %3574 = vmatpush1.bf16.msra.mxu1 (!%p2918_p13), %v4764_v52  ;;  %v4854_v51 = vld [vmem:[%s6237_s2 + $0x2e8] ss:$16 sps:$4 sm:$0xff] (!%p2918_p13)   ;;  %v4855_v52 = vld [vmem:[%s6237_s2 + $0x304] ss:$16 sps:$4 sm:$0xff] (!%p2918_p13)  }
 0x13c   : > { %3448 = vmatprep.subr.bf16.mxu0 (!%p2918_p13), %v4765_v53  ;;  %3576 = vmatprep.subr.bf16.mxu1 (!%p2918_p13), %v4767_v54  ;;  %v4858_v53 = vld [vmem:[%s6237_s2 + $0x30c] ss:$16 sps:$4 sm:$0xff] (!%p2918_p13)   ;;  %v4857_v54 = vld [vmem:[%s6237_s2 + $0x300] ss:$16 sps:$4 sm:$0xff] (!%p2918_p13)  }
 0x13f   : > { %3450 = vmatpush1.bf16.msra.mxu0 (!%p2918_p13), %v4769_v55  ;;  %3578 = vmatpush1.bf16.msra.mxu1 (!%p2918_p13), %v4770_v56  ;;  %v4860_v55 = vld [vmem:[%s6237_s2 + $0x308] ss:$16 sps:$4 sm:$0xff] (!%p2918_p13)   ;;  %v4861_v56 = vld [vmem:[%s6237_s2 + $0x324] ss:$16 sps:$4 sm:$0xff] (!%p2918_p13)  }
 0x140   : > { %3452 = vmatprep.subr.bf16.mxu0 (!%p2918_p13), %v4771_v57  ;;  %3580 = vmatprep.subr.bf16.mxu1 (!%p2918_p13), %v4773_v58  ;;  %v4864_v57 = vld [vmem:[%s6237_s2 + $0x32c] ss:$16 sps:$4 sm:$0xff] (!%p2918_p13)   ;;  %v4863_v58 = vld [vmem:[%s6237_s2 + $0x320] ss:$16 sps:$4 sm:$0xff] (!%p2918_p13)  }
 0x143   : > { %3454 = vmatpush1.bf16.msra.mxu0 (!%p2918_p13), %v4775_v59  ;;  %3582 = vmatpush1.bf16.msra.mxu1 (!%p2918_p13), %v4776_v60  ;;  %v4866_v59 = vld [vmem:[%s6237_s2 + $0x328] ss:$16 sps:$4 sm:$0xff] (!%p2918_p13)   ;;  %v4867_v60 = vld [vmem:[%s6237_s2 + $0x344] ss:$16 sps:$4 sm:$0xff] (!%p2918_p13)  }
 0x144   : > { %3456 = vmatprep.subr.bf16.mxu0 (!%p2918_p13), %v4777_v61  ;;  %3584 = vmatprep.subr.bf16.mxu1 (!%p2918_p13), %v4779_v62  ;;  %v4870_v61 = vld [vmem:[%s6237_s2 + $0x34c] ss:$16 sps:$4 sm:$0xff] (!%p2918_p13)   ;;  %v4869_v62 = vld [vmem:[%s6237_s2 + $0x340] ss:$16 sps:$4 sm:$0xff] (!%p2918_p13)  }
 0x147   : > { %3458 = vmatpush1.bf16.msra.mxu0 (!%p2918_p13), %v4781_v0  ;;  %3586 = vmatpush1.bf16.msra.mxu1 (!%p2918_p13), %v4782_v1  ;;  %v4873_v0 = vld [vmem:[%s6237_s2 + $0x364] ss:$16 sps:$4 sm:$0xff] (!%p2918_p13)   ;;  %v4876_v1 = vld [vmem:[%s6237_s2 + $0x36c] ss:$16 sps:$4 sm:$0xff] (!%p2918_p13)  }
 0x148   : > { %3460 = vmatprep.subr.bf16.mxu0 (!%p2918_p13), %v4783_v2  ;;  %3588 = vmatprep.subr.bf16.mxu1 (!%p2918_p13), %v4785_v3  ;;  %v4875_v2 = vld [vmem:[%s6237_s2 + $0x360] ss:$16 sps:$4 sm:$0xff] (!%p2918_p13)   ;;  %v4878_v3 = vld [vmem:[%s6237_s2 + $0x368] ss:$16 sps:$4 sm:$0xff] (!%p2918_p13)  }
 0x14b   : > { %3462 = vmatpush1.bf16.msra.mxu0 (!%p2918_p13), %v4787_v4  ;;  %v4879_v4 = vld [vmem:[%s6237_s2 + $0x384] ss:$16 sps:$4 sm:$0xff] (!%p2918_p13)  }
 0x1eb   : > { %1098 = sbr.rel (%p2918_p13) target bundleno = 1291 (0x50b), region = 72 }
 0x1ed   : > { %v940_v9 = vpop.f32.mrb[0].mxu0  ;;  %v1082_v10 = vpop.f32.mrb[0].mxu1 }
 0x1ee   : > { %v1087_v11 = vadd.f32 %v940_v9, %v411_v5  ;;  %v1089_v12 = vadd.f32 %v1082_v10, %v413_v6  ;;  %v942_v13 = vpop.f32.mrb[1].mxu0  ;;  %v1084_v14 = vpop.f32.mrb[1].mxu1  ;;  %v4788_v5 = vld [vmem:[%s6237_s2 + $0x188] ss:$16 sps:$4 sm:$0xff] (!%p2918_p13)   ;;  %v4789_v6 = vld [vmem:[%s6237_s2 + $0x1a4] ss:$16 sps:$4 sm:$0xff] (!%p2918_p13)  }
 0x1ef   : > { %v1088_v15 = vadd.f32 %v942_v13, %v412_v7  ;;  %v1090_v16 = vadd.f32 %v1084_v14, %v414_v8  ;;  %v4791_v7 = vld [vmem:[%s6237_s2 + $0x1ac] ss:$16 sps:$4 sm:$0xff] (!%p2918_p13)   ;;  %3590 = vmatpush1.bf16.msra.mxu1 (!%p2918_p13), %v4788_v5  ;;  %v4793_v8 = vld [vmem:[%s6237_s2 + $0x1a0] ss:$16 sps:$4 sm:$0xff] (!%p2918_p13)   ;;  %v4794_v9 = vld [vmem:[%s6237_s2 + $0x1a8] ss:$16 sps:$4 sm:$0xff] (!%p2918_p13)   ;;  %3464 = vmatprep.subr.bf16.mxu0 (!%p2918_p13), %v4789_v6 }
 0x1f0   : > { %1091 = vst [vmem:[#allocation2] sm:$0xff] %v1087_v11  ;;  %1093 = vst [vmem:[#allocation2 + $0x10] sm:$0xff] %v1089_v12  ;;  %3592 = vmatprep.subr.bf16.mxu1 (!%p2918_p13), %v4791_v7  ;;  %v4795_v10 = vld [vmem:[%s6237_s2 + $0x1c4] ss:$16 sps:$4 sm:$0xff] (!%p2918_p13)   ;;  %v4797_v11 = vld [vmem:[%s6237_s2 + $0x1cc] ss:$16 sps:$4 sm:$0xff] (!%p2918_p13)   ;;  %3466 = vmatpush1.bf16.msra.mxu0 (!%p2918_p13), %v4793_v8 }
 0x1f1   : > { %1092 = vst [vmem:[#allocation2 + $0x8] sm:$0xff] %v1088_v15  ;;  %1094 = vst [vmem:[#allocation2 + $0x18] sm:$0xff] %v1090_v16  ;;  %v4799_v12 = vld [vmem:[%s6237_s2 + $0x1c0] ss:$16 sps:$4 sm:$0xff] (!%p2918_p13)   ;;  %v4800_v13 = vld [vmem:[%s6237_s2 + $0x1c8] ss:$16 sps:$4 sm:$0xff] (!%p2918_p13)   ;;  %3468 = vmatprep.subr.bf16.mxu0 (!%p2918_p13), %v4795_v10 }
 0x1f2   : > { %v4801_v14 = vld [vmem:[%s6237_s2 + $0x1e4] ss:$16 sps:$4 sm:$0xff]   ;;  %v4803_v15 = vld [vmem:[%s6237_s2 + $0x1ec] ss:$16 sps:$4 sm:$0xff]   ;;  %v4805_v16 = vld [vmem:[%s6237_s2 + $0x1e0] ss:$16 sps:$4 sm:$0xff]  }
 0x1f3   : > { %3594 = vmatpush1.bf16.msra.mxu1 %v4794_v9  ;;  %v4882_v5 = vld [vmem:[%s6237_s2 + $0x38c] ss:$16 sps:$4 sm:$0xff]   ;;  %v4881_v6 = vld [vmem:[%s6237_s2 + $0x380] ss:$16 sps:$4 sm:$0xff]   ;;  %v4884_v7 = vld [vmem:[%s6237_s2 + $0x388] ss:$16 sps:$4 sm:$0xff]  }
 0x1f4   : > { %3596 = vmatprep.subr.bf16.mxu1 %v4797_v11  ;;  %3470 = vmatpush1.bf16.msra.mxu0 %v4799_v12  ;;  %v4885_v8 = vld [vmem:[%s6237_s2 + $0x3a4] ss:$16 sps:$4 sm:$0xff]   ;;  %v4888_v9 = vld [vmem:[%s6237_s2 + $0x3ac] ss:$16 sps:$4 sm:$0xff]   ;;  %v4887_v10 = vld [vmem:[%s6237_s2 + $0x3a0] ss:$16 sps:$4 sm:$0xff]  }
 0x1f5   : > { %3472 = vmatprep.subr.bf16.mxu0 %v4801_v14  ;;  %v4890_v11 = vld [vmem:[%s6237_s2 + $0x3a8] ss:$16 sps:$4 sm:$0xff]   ;;  %v4891_v12 = vld [vmem:[%s6237_s2 + $0x3c4] ss:$16 sps:$4 sm:$0xff]   ;;  %v4893_v14 = vld [vmem:[%s6237_s2 + $0x3c0] ss:$16 sps:$4 sm:$0xff]  }
 0x1f7   : > { %3598 = vmatpush1.bf16.msra.mxu1 %v4800_v13  ;;  %v1099_v22 = vld [vmem:[#allocation2] sm:$0xff]  ;;  %v4894_v13 = vld [vmem:[%s6237_s2 + $0x3cc] ss:$16 sps:$4 sm:$0xff]  }
 0x1f8   : > { %v1100_v63 = vld [vmem:[#allocation2 + $0x8] sm:$0xff]  ;;  %3600 = vmatprep.subr.bf16.mxu1 %v4803_v15  ;;  %3474 = vmatpush1.bf16.msra.mxu0 %v4805_v16  ;;  %v1102_v45 = vld [vmem:[#allocation2 + $0x18] sm:$0xff]  ;;  %v4897_v16 = vld [vmem:[%s6237_s2 + $0x3e4] ss:$16 sps:$4 sm:$0xff]  }
 0x1f9   : > { %1573 = vmatprep.mubr.f32.mxu0 %v1100_v63  ;;  %1715 = vmatprep.mubr.f32.mxu1 %v1100_v63  ;;  %v4872_v63 = vld [vmem:[%s6237_s2 + $0x348] ss:$16 sps:$4 sm:$0xff]  }
 0x1fa   : > { %3476 = vmatprep.subr.bf16.mxu0 %v4807_v18  ;;  %v4896_v15 = vld [vmem:[%s6237_s2 + $0x3c8] ss:$16 sps:$4 sm:$0xff]   ;;  %v4899_v18 = vld [vmem:[%s6237_s2 + $0x3e0] ss:$16 sps:$4 sm:$0xff]  }
 0x1fb   : > { %3602 = vmatpush1.bf16.msra.mxu1 %v4806_v17  ;;  %1574 = vmatmul.mubr.f32.vlgmr.msra.gmra.mrb[0].mxu0 %v1099_v22  ;;  %v4900_v17 = vld [vmem:[%s6237_s2 + $0x3ec] ss:$16 sps:$4 sm:$0xff]  }
 0x1fc   : > { %3604 = vmatprep.subr.bf16.mxu1 %v4810_v19  ;;  %3478 = vmatpush1.bf16.msra.mxu0 %v4809_v20  ;;  %v4902_v19 = vld [vmem:[%s6237_s2 + $0x3e8] ss:$16 sps:$4 sm:$0xff]   ;;  %v4903_v20 = vld [vmem:[#allocation6 + $0x4] ss:$16 sps:$4 sm:$0xff]  }
 0x1fd   : > { %3480 = vmatprep.subr.bf16.mxu0 %v4813_v23  ;;  %1644 = vmatprep.mubr.f32.mxu0 %v1102_v45  ;;  %v4905_v23 = vld [vmem:[#allocation6] ss:$16 sps:$4 sm:$0xff]  }
 0x1fe   : > { %1716 = vmatmul.mubr.f32.vlgmr.msra.gmra.mrb[0].mxu1 %v1099_v22  ;;  %v1101_v22 = vld [vmem:[#allocation2 + $0x10] sm:$0xff] }
 0x1ff   : > { %3606 = vmatpush1.bf16.msra.mxu1 %v4812_v21  ;;  %1786 = vmatprep.mubr.f32.mxu1 %v1102_v45  ;;  %v4906_v21 = vld [vmem:[#allocation6 + $0xc] ss:$16 sps:$4 sm:$0xff]   ;;  %v4939_v45 = vld [vmem:[#allocation6 + $0xc4] ss:$16 sps:$4 sm:$0xff]  }
 0x200   : > { %3608 = vmatprep.subr.bf16.mxu1 %v4816_v24  ;;  %3482 = vmatpush1.bf16.msra.mxu0 %v4815_v25  ;;  %v4908_v24 = vld [vmem:[#allocation6 + $0x8] ss:$16 sps:$4 sm:$0xff]   ;;  %v4909_v25 = vld [vmem:[#allocation6 + $0x24] ss:$16 sps:$4 sm:$0xff]  }
 0x201   : > { %3484 = vmatprep.subr.bf16.mxu0 %v4819_v27  ;;  %v4911_v27 = vld [vmem:[#allocation6 + $0x20] ss:$16 sps:$4 sm:$0xff]  }
 0x203   : > { %3610 = vmatpush1.bf16.msra.mxu1 %v4818_v26  ;;  %v4912_v26 = vld [vmem:[#allocation6 + $0x2c] ss:$16 sps:$4 sm:$0xff]  }
 0x204   : > { %3612 = vmatprep.subr.bf16.mxu1 %v4822_v28  ;;  %3486 = vmatpush1.bf16.msra.mxu0 %v4821_v29  ;;  %v4914_v28 = vld [vmem:[#allocation6 + $0x28] ss:$16 sps:$4 sm:$0xff]   ;;  %v4915_v29 = vld [vmem:[#allocation6 + $0x44] ss:$16 sps:$4 sm:$0xff]  }
 0x205   : > { %3488 = vmatprep.subr.bf16.mxu0 %v4825_v31  ;;  %v4917_v31 = vld [vmem:[#allocation6 + $0x40] ss:$16 sps:$4 sm:$0xff]  }
 0x207   : > { %3614 = vmatpush1.bf16.msra.mxu1 %v4824_v30  ;;  %v4918_v30 = vld [vmem:[#allocation6 + $0x4c] ss:$16 sps:$4 sm:$0xff]  }
 0x208   : > { %3616 = vmatprep.subr.bf16.mxu1 %v4828_v32  ;;  %3490 = vmatpush1.bf16.msra.mxu0 %v4827_v33  ;;  %v4920_v32 = vld [vmem:[#allocation6 + $0x48] ss:$16 sps:$4 sm:$0xff]   ;;  %v4921_v33 = vld [vmem:[#allocation6 + $0x64] ss:$16 sps:$4 sm:$0xff]  }
 0x209   : > { %3492 = vmatprep.subr.bf16.mxu0 %v4831_v35  ;;  %v4923_v35 = vld [vmem:[#allocation6 + $0x60] ss:$16 sps:$4 sm:$0xff]  }
 0x20b   : > { %3618 = vmatpush1.bf16.msra.mxu1 %v4830_v34  ;;  %v4924_v34 = vld [vmem:[#allocation6 + $0x6c] ss:$16 sps:$4 sm:$0xff]  }
 0x20c   : > { %3620 = vmatprep.subr.bf16.mxu1 %v4834_v36  ;;  %3494 = vmatpush1.bf16.msra.mxu0 %v4833_v37  ;;  %v4926_v36 = vld [vmem:[#allocation6 + $0x68] ss:$16 sps:$4 sm:$0xff]   ;;  %v4927_v37 = vld [vmem:[#allocation6 + $0x84] ss:$16 sps:$4 sm:$0xff]  }
 0x20d   : > { %3496 = vmatprep.subr.bf16.mxu0 %v4837_v39  ;;  %v4929_v39 = vld [vmem:[#allocation6 + $0x80] ss:$16 sps:$4 sm:$0xff]  }
 0x20f   : > { %3622 = vmatpush1.bf16.msra.mxu1 %v4836_v38  ;;  %v4930_v38 = vld [vmem:[#allocation6 + $0x8c] ss:$16 sps:$4 sm:$0xff]  }
 0x210   : > { %3624 = vmatprep.subr.bf16.mxu1 %v4840_v40  ;;  %3498 = vmatpush1.bf16.msra.mxu0 %v4839_v41  ;;  %v4932_v40 = vld [vmem:[#allocation6 + $0x88] ss:$16 sps:$4 sm:$0xff]   ;;  %v4933_v41 = vld [vmem:[#allocation6 + $0xa4] ss:$16 sps:$4 sm:$0xff]  }
 0x211   : > { %3500 = vmatprep.subr.bf16.mxu0 %v4843_v43  ;;  %v4935_v43 = vld [vmem:[#allocation6 + $0xa0] ss:$16 sps:$4 sm:$0xff]  }
 0x213   : > { %3626 = vmatpush1.bf16.msra.mxu1 %v4842_v42  ;;  %v4936_v42 = vld [vmem:[#allocation6 + $0xac] ss:$16 sps:$4 sm:$0xff]  }
 0x214   : > { %3628 = vmatprep.subr.bf16.mxu1 %v4846_v44  ;;  %3502 = vmatpush1.bf16.msra.mxu0 %v4845_v46  ;;  %v4938_v44 = vld [vmem:[#allocation6 + $0xa8] ss:$16 sps:$4 sm:$0xff]   ;;  %v4942_v46 = vld [vmem:[#allocation6 + $0xcc] ss:$16 sps:$4 sm:$0xff]  }
 0x215   : > { %3504 = vmatprep.subr.bf16.mxu0 %v4849_v48  ;;  %v4944_v48 = vld [vmem:[#allocation6 + $0xc8] ss:$16 sps:$4 sm:$0xff]  }
 0x217   : > { %3630 = vmatpush1.bf16.msra.mxu1 %v4848_v47  ;;  %v4941_v47 = vld [vmem:[#allocation6 + $0xc0] ss:$16 sps:$4 sm:$0xff]  }
 0x218   : > { %3632 = vmatprep.subr.bf16.mxu1 %v4852_v49  ;;  %3506 = vmatpush1.bf16.msra.mxu0 %v4851_v50  ;;  %v4945_v49 = vld [vmem:[#allocation6 + $0xe4] ss:$16 sps:$4 sm:$0xff]   ;;  %v4948_v50 = vld [vmem:[#allocation6 + $0xec] ss:$16 sps:$4 sm:$0xff]  }
 0x219   : > { %3508 = vmatprep.subr.bf16.mxu0 %v4855_v52  ;;  %v4950_v52 = vld [vmem:[#allocation6 + $0xe8] ss:$16 sps:$4 sm:$0xff]  }
 0x21b   : > { %3634 = vmatpush1.bf16.msra.mxu1 %v4854_v51  ;;  %v4947_v51 = vld [vmem:[#allocation6 + $0xe0] ss:$16 sps:$4 sm:$0xff]  }
 0x21c   : > { %3636 = vmatprep.subr.bf16.mxu1 %v4858_v53  ;;  %3510 = vmatpush1.bf16.msra.mxu0 %v4857_v54  ;;  %v4951_v53 = vld [vmem:[#allocation6 + $0x104] ss:$16 sps:$4 sm:$0xff]   ;;  %v4954_v54 = vld [vmem:[#allocation6 + $0x10c] ss:$16 sps:$4 sm:$0xff]  }
 0x21d   : > { %3512 = vmatprep.subr.bf16.mxu0 %v4861_v56  ;;  %v4956_v56 = vld [vmem:[#allocation6 + $0x108] ss:$16 sps:$4 sm:$0xff]  }
 0x21f   : > { %3638 = vmatpush1.bf16.msra.mxu1 %v4860_v55  ;;  %v4953_v55 = vld [vmem:[#allocation6 + $0x100] ss:$16 sps:$4 sm:$0xff]  }
 0x220   : > { %3640 = vmatprep.subr.bf16.mxu1 %v4864_v57  ;;  %3514 = vmatpush1.bf16.msra.mxu0 %v4863_v58  ;;  %v4957_v57 = vld [vmem:[#allocation6 + $0x124] ss:$16 sps:$4 sm:$0xff]   ;;  %v4960_v58 = vld [vmem:[#allocation6 + $0x12c] ss:$16 sps:$4 sm:$0xff]  }
 0x221   : > { %3516 = vmatprep.subr.bf16.mxu0 %v4867_v60  ;;  %v4962_v60 = vld [vmem:[#allocation6 + $0x128] ss:$16 sps:$4 sm:$0xff]  }
 0x223   : > { %3642 = vmatpush1.bf16.msra.mxu1 %v4866_v59  ;;  %v4959_v59 = vld [vmem:[#allocation6 + $0x120] ss:$16 sps:$4 sm:$0xff]  }
 0x224   : > { %3644 = vmatprep.subr.bf16.mxu1 %v4870_v61  ;;  %3518 = vmatpush1.bf16.msra.mxu0 %v4869_v62  ;;  %v4963_v61 = vld [vmem:[#allocation6 + $0x144] ss:$16 sps:$4 sm:$0xff]   ;;  %v4966_v62 = vld [vmem:[#allocation6 + $0x14c] ss:$16 sps:$4 sm:$0xff]  }
 0x225   : > { %3520 = vmatprep.subr.bf16.mxu0 %v4873_v0  ;;  %v4968_v0 = vld [vmem:[#allocation6 + $0x148] ss:$16 sps:$4 sm:$0xff]  }
 0x227   : > { %3646 = vmatpush1.bf16.msra.mxu1 %v4872_v63  ;;  %v4965_v63 = vld [vmem:[#allocation6 + $0x140] ss:$16 sps:$4 sm:$0xff]  }
 0x228   : > { %3648 = vmatprep.subr.bf16.mxu1 %v4876_v1  ;;  %3522 = vmatpush1.bf16.msra.mxu0 %v4875_v2  ;;  %v4969_v1 = vld [vmem:[#allocation6 + $0x164] ss:$16 sps:$4 sm:$0xff]   ;;  %v4972_v2 = vld [vmem:[#allocation6 + $0x16c] ss:$16 sps:$4 sm:$0xff]  }
 0x229   : > { %3524 = vmatprep.subr.bf16.mxu0 %v4879_v4  ;;  %v4974_v4 = vld [vmem:[#allocation6 + $0x168] ss:$16 sps:$4 sm:$0xff]  }
 0x22b   : > { %3650 = vmatpush1.bf16.msra.mxu1 %v4878_v3  ;;  %v4971_v3 = vld [vmem:[#allocation6 + $0x160] ss:$16 sps:$4 sm:$0xff]  }
 0x22c   : > { %3652 = vmatprep.subr.bf16.mxu1 %v4882_v5  ;;  %3526 = vmatpush1.bf16.msra.mxu0 %v4881_v6  ;;  %v4975_v5 = vld [vmem:[#allocation6 + $0x184] ss:$16 sps:$4 sm:$0xff]   ;;  %v4978_v6 = vld [vmem:[#allocation6 + $0x18c] ss:$16 sps:$4 sm:$0xff]  }
 0x22d   : > { %3528 = vmatprep.subr.bf16.mxu0 %v4885_v8  ;;  %v4980_v8 = vld [vmem:[#allocation6 + $0x188] ss:$16 sps:$4 sm:$0xff]  }
 0x22f   : > { %3654 = vmatpush1.bf16.msra.mxu1 %v4884_v7  ;;  %v4977_v7 = vld [vmem:[#allocation6 + $0x180] ss:$16 sps:$4 sm:$0xff]  }
 0x230   : > { %3656 = vmatprep.subr.bf16.mxu1 %v4888_v9  ;;  %3530 = vmatpush1.bf16.msra.mxu0 %v4887_v10  ;;  %v4981_v9 = vld [vmem:[#allocation6 + $0x1a4] ss:$16 sps:$4 sm:$0xff]   ;;  %v4984_v10 = vld [vmem:[#allocation6 + $0x1ac] ss:$16 sps:$4 sm:$0xff]  }
 0x231   : > { %3532 = vmatprep.subr.bf16.mxu0 %v4891_v12  ;;  %v4986_v12 = vld [vmem:[#allocation6 + $0x1a8] ss:$16 sps:$4 sm:$0xff]  }
 0x233   : > { %3658 = vmatpush1.bf16.msra.mxu1 %v4890_v11  ;;  %v4983_v11 = vld [vmem:[#allocation6 + $0x1a0] ss:$16 sps:$4 sm:$0xff]  }
 0x234   : > { %3660 = vmatprep.subr.bf16.mxu1 %v4894_v13  ;;  %3534 = vmatpush1.bf16.msra.mxu0 %v4893_v14  ;;  %v4987_v13 = vld [vmem:[#allocation6 + $0x1c4] ss:$16 sps:$4 sm:$0xff]   ;;  %v4990_v14 = vld [vmem:[#allocation6 + $0x1cc] ss:$16 sps:$4 sm:$0xff]  }
 0x235   : > { %3536 = vmatprep.subr.bf16.mxu0 %v4897_v16  ;;  %v4992_v16 = vld [vmem:[#allocation6 + $0x1c8] ss:$16 sps:$4 sm:$0xff]  }
 0x237   : > { %3662 = vmatpush1.bf16.msra.mxu1 %v4896_v15  ;;  %v4989_v15 = vld [vmem:[#allocation6 + $0x1c0] ss:$16 sps:$4 sm:$0xff]  }
 0x238   : > { %3664 = vmatprep.subr.bf16.mxu1 %v4900_v17  ;;  %3538 = vmatpush1.bf16.msra.mxu0 %v4899_v18  ;;  %v4993_v17 = vld [vmem:[#allocation6 + $0x1e4] ss:$16 sps:$4 sm:$0xff]   ;;  %v4996_v18 = vld [vmem:[#allocation6 + $0x1ec] ss:$16 sps:$4 sm:$0xff]  }
 0x239   : > { %3668 = vmatprep.subr.bf16.mxu0 %v4903_v20  ;;  %v4998_v20 = vld [vmem:[#allocation6 + $0x1e8] ss:$16 sps:$4 sm:$0xff]  }
 0x23b   : > { %3666 = vmatpush1.bf16.msra.mxu1 %v4902_v19  ;;  %1645 = vmatmul.mubr.f32.vlgmr.msra.gmra.mrb[0].mxu0 %v1101_v22  ;;  %v4995_v19 = vld [vmem:[#allocation6 + $0x1e0] ss:$16 sps:$4 sm:$0xff]  }
 0x23c   : > { %3796 = vmatprep.subr.bf16.mxu1 %v4906_v21  ;;  %3670 = vmatpush1.bf16.msra.mxu0 %v4905_v23  ;;  %v4999_v21 = vld [vmem:[#allocation6 + $0x204] ss:$16 sps:$4 sm:$0xff]   ;;  %v1489_v23 = vlaneseq }
 0x23d   : > { %3672 = vmatprep.subr.bf16.mxu0 %v4909_v25 }
 0x23e   : > { %1787 = vmatmul.mubr.f32.vlgmr.msra.gmra.mrb[0].mxu1 %v1101_v22  ;;  %v5002_v22 = vld [vmem:[#allocation6 + $0x20c] ss:$16 sps:$4 sm:$0xff]  }
 0x23f   : > { %3798 = vmatpush1.bf16.msra.mxu1 %v4908_v24  ;;  %v6129_v24 = vshrl.u32 %v1489_v23, 7  ;;  %v5070_v23 = vld [vmem:[#allocation6 + $0x368] ss:$16 sps:$4 sm:$0xff]  }
 0x240   : > { %3800 = vmatprep.subr.bf16.mxu1 %v4912_v26  ;;  %3674 = vmatpush1.bf16.msra.mxu0 %v4911_v27  ;;  %v6135_v26 = vld [vmem:[%s6281_s3] sm:$0xf] }
 0x241   : > { %3676 = vmatprep.subr.bf16.mxu0 %v4915_v29  ;;  %v1491_v25 = vsub.s32 0, %v6129_v24  ;;  %v1495_v27 = vsub.s32 1, %v6129_v24 }
 0x243   : > { %3802 = vmatpush1.bf16.msra.mxu1 %v4914_v28  ;;  %v1503_v28 = vsub.s32 3, %v6129_v24  ;;  %v1492_v29 = vrot.slane %v6135_v26, %v1491_v25 }
 0x244   : > { %3804 = vmatprep.subr.bf16.mxu1 %v4918_v30  ;;  %3678 = vmatpush1.bf16.msra.mxu0 %v4917_v31  ;;  %v1496_v30 = vrot.slane %v6135_v26, %v1495_v27 }
 0x245   : > { %3680 = vmatprep.subr.bf16.mxu0 %v4921_v33  ;;  %v1504_v31 = vrot.slane %v6135_v26, %v1503_v28 }
 0x247   : > { %3806 = vmatpush1.bf16.msra.mxu1 %v4920_v32 }
 0x248   : > { %3808 = vmatprep.subr.bf16.mxu1 %v4924_v34  ;;  %3682 = vmatpush1.bf16.msra.mxu0 %v4923_v35 }
 0x249   : > { %3684 = vmatprep.subr.bf16.mxu0 %v4927_v37 }
 0x24b   : > { %3810 = vmatpush1.bf16.msra.mxu1 %v4926_v36 }
 0x24c   : > { %3812 = vmatprep.subr.bf16.mxu1 %v4930_v38  ;;  %3686 = vmatpush1.bf16.msra.mxu0 %v4929_v39 }
 0x24d   : > { %3688 = vmatprep.subr.bf16.mxu0 %v4933_v41  ;;  %v5004_v41 = vld [vmem:[#allocation6 + $0x208] ss:$16 sps:$4 sm:$0xff]  }
 0x24f   : > { %3814 = vmatpush1.bf16.msra.mxu1 %v4932_v40  ;;  %v5001_v40 = vld [vmem:[#allocation6 + $0x200] ss:$16 sps:$4 sm:$0xff]  }
 0x250   : > { %3816 = vmatprep.subr.bf16.mxu1 %v4936_v42  ;;  %3690 = vmatpush1.bf16.msra.mxu0 %v4935_v43  ;;  %v5005_v43 = vld [vmem:[#allocation6 + $0x224] ss:$16 sps:$4 sm:$0xff]  }
 0x251   : > { %3692 = vmatprep.subr.bf16.mxu0 %v4939_v45 }
 0x253   : > { %3818 = vmatpush1.bf16.msra.mxu1 %v4938_v44  ;;  %v5008_v44 = vld [vmem:[#allocation6 + $0x22c] ss:$16 sps:$4 sm:$0xff]  }
 0x254   : > { %3820 = vmatprep.subr.bf16.mxu1 %v4942_v46  ;;  %3694 = vmatpush1.bf16.msra.mxu0 %v4941_v47  ;;  %v5007_v46 = vld [vmem:[#allocation6 + $0x220] ss:$16 sps:$4 sm:$0xff]   ;;  %v5010_v47 = vld [vmem:[#allocation6 + $0x228] ss:$16 sps:$4 sm:$0xff]  }
 0x255   : > { %3696 = vmatprep.subr.bf16.mxu0 %v4945_v49  ;;  %v5014_v49 = vld [vmem:[#allocation6 + $0x24c] ss:$16 sps:$4 sm:$0xff]  }
 0x257   : > { %3822 = vmatpush1.bf16.msra.mxu1 %v4944_v48  ;;  %v5011_v48 = vld [vmem:[#allocation6 + $0x244] ss:$16 sps:$4 sm:$0xff]  }
 0x258   : > { %3824 = vmatprep.subr.bf16.mxu1 %v4948_v50  ;;  %3698 = vmatpush1.bf16.msra.mxu0 %v4947_v51  ;;  %v5013_v50 = vld [vmem:[#allocation6 + $0x240] ss:$16 sps:$4 sm:$0xff]   ;;  %v5016_v51 = vld [vmem:[#allocation6 + $0x248] ss:$16 sps:$4 sm:$0xff]  }
 0x259   : > { %3700 = vmatprep.subr.bf16.mxu0 %v4951_v53  ;;  %v5020_v53 = vld [vmem:[#allocation6 + $0x26c] ss:$16 sps:$4 sm:$0xff]  }
 0x25b   : > { %3826 = vmatpush1.bf16.msra.mxu1 %v4950_v52  ;;  %v5017_v52 = vld [vmem:[#allocation6 + $0x264] ss:$16 sps:$4 sm:$0xff]  }
 0x25c   : > { %3828 = vmatprep.subr.bf16.mxu1 %v4954_v54  ;;  %3702 = vmatpush1.bf16.msra.mxu0 %v4953_v55  ;;  %v5019_v54 = vld [vmem:[#allocation6 + $0x260] ss:$16 sps:$4 sm:$0xff]   ;;  %v5022_v55 = vld [vmem:[#allocation6 + $0x268] ss:$16 sps:$4 sm:$0xff]  }
 0x25d   : > { %3704 = vmatprep.subr.bf16.mxu0 %v4957_v57  ;;  %v5026_v57 = vld [vmem:[#allocation6 + $0x28c] ss:$16 sps:$4 sm:$0xff]  }
 0x25f   : > { %3830 = vmatpush1.bf16.msra.mxu1 %v4956_v56  ;;  %v5023_v56 = vld [vmem:[#allocation6 + $0x284] ss:$16 sps:$4 sm:$0xff]  }
 0x260   : > { %3832 = vmatprep.subr.bf16.mxu1 %v4960_v58  ;;  %3706 = vmatpush1.bf16.msra.mxu0 %v4959_v59  ;;  %v5025_v58 = vld [vmem:[#allocation6 + $0x280] ss:$16 sps:$4 sm:$0xff]   ;;  %v5028_v59 = vld [vmem:[#allocation6 + $0x288] ss:$16 sps:$4 sm:$0xff]  }
 0x261   : > { %3708 = vmatprep.subr.bf16.mxu0 %v4963_v61  ;;  %v5032_v61 = vld [vmem:[#allocation6 + $0x2ac] ss:$16 sps:$4 sm:$0xff]  }
 0x263   : > { %3834 = vmatpush1.bf16.msra.mxu1 %v4962_v60  ;;  %v5029_v60 = vld [vmem:[#allocation6 + $0x2a4] ss:$16 sps:$4 sm:$0xff]  }
 0x264   : > { %3836 = vmatprep.subr.bf16.mxu1 %v4966_v62  ;;  %3710 = vmatpush1.bf16.msra.mxu0 %v4965_v63  ;;  %v5031_v62 = vld [vmem:[#allocation6 + $0x2a0] ss:$16 sps:$4 sm:$0xff]   ;;  %v5034_v63 = vld [vmem:[#allocation6 + $0x2a8] ss:$16 sps:$4 sm:$0xff]  }
 0x265   : > { %3712 = vmatprep.subr.bf16.mxu0 %v4969_v1  ;;  %v5038_v1 = vld [vmem:[#allocation6 + $0x2cc] ss:$16 sps:$4 sm:$0xff]  }
 0x267   : > { %3838 = vmatpush1.bf16.msra.mxu1 %v4968_v0  ;;  %v5035_v0 = vld [vmem:[#allocation6 + $0x2c4] ss:$16 sps:$4 sm:$0xff]  }
 0x268   : > { %3840 = vmatprep.subr.bf16.mxu1 %v4972_v2  ;;  %3714 = vmatpush1.bf16.msra.mxu0 %v4971_v3  ;;  %v5037_v2 = vld [vmem:[#allocation6 + $0x2c0] ss:$16 sps:$4 sm:$0xff]   ;;  %v5040_v3 = vld [vmem:[#allocation6 + $0x2c8] ss:$16 sps:$4 sm:$0xff]  }
 0x269   : > { %3716 = vmatprep.subr.bf16.mxu0 %v4975_v5  ;;  %v5044_v5 = vld [vmem:[#allocation6 + $0x2ec] ss:$16 sps:$4 sm:$0xff]  }
 0x26b   : > { %3842 = vmatpush1.bf16.msra.mxu1 %v4974_v4  ;;  %v5041_v4 = vld [vmem:[#allocation6 + $0x2e4] ss:$16 sps:$4 sm:$0xff]  }
 0x26c   : > { %3844 = vmatprep.subr.bf16.mxu1 %v4978_v6  ;;  %3718 = vmatpush1.bf16.msra.mxu0 %v4977_v7  ;;  %v5043_v6 = vld [vmem:[#allocation6 + $0x2e0] ss:$16 sps:$4 sm:$0xff]   ;;  %v5046_v7 = vld [vmem:[#allocation6 + $0x2e8] ss:$16 sps:$4 sm:$0xff]  }
 0x26d   : > { %3720 = vmatprep.subr.bf16.mxu0 %v4981_v9  ;;  %v5050_v9 = vld [vmem:[#allocation6 + $0x30c] ss:$16 sps:$4 sm:$0xff]  }
 0x26f   : > { %3846 = vmatpush1.bf16.msra.mxu1 %v4980_v8  ;;  %v5047_v8 = vld [vmem:[#allocation6 + $0x304] ss:$16 sps:$4 sm:$0xff]  }
 0x270   : > { %3848 = vmatprep.subr.bf16.mxu1 %v4984_v10  ;;  %3722 = vmatpush1.bf16.msra.mxu0 %v4983_v11  ;;  %v5049_v10 = vld [vmem:[#allocation6 + $0x300] ss:$16 sps:$4 sm:$0xff]   ;;  %v5052_v11 = vld [vmem:[#allocation6 + $0x308] ss:$16 sps:$4 sm:$0xff]  }
 0x271   : > { %3724 = vmatprep.subr.bf16.mxu0 %v4987_v13  ;;  %v5056_v13 = vld [vmem:[#allocation6 + $0x32c] ss:$16 sps:$4 sm:$0xff]  }
 0x273   : > { %3850 = vmatpush1.bf16.msra.mxu1 %v4986_v12  ;;  %v5053_v12 = vld [vmem:[#allocation6 + $0x324] ss:$16 sps:$4 sm:$0xff]  }
 0x274   : > { %3852 = vmatprep.subr.bf16.mxu1 %v4990_v14  ;;  %3726 = vmatpush1.bf16.msra.mxu0 %v4989_v15  ;;  %v5055_v14 = vld [vmem:[#allocation6 + $0x320] ss:$16 sps:$4 sm:$0xff]   ;;  %v5058_v15 = vld [vmem:[#allocation6 + $0x328] ss:$16 sps:$4 sm:$0xff]  }
 0x275   : > { %3728 = vmatprep.subr.bf16.mxu0 %v4993_v17  ;;  %v5062_v17 = vld [vmem:[#allocation6 + $0x34c] ss:$16 sps:$4 sm:$0xff]  }
 0x277   : > { %3854 = vmatpush1.bf16.msra.mxu1 %v4992_v16  ;;  %v5059_v16 = vld [vmem:[#allocation6 + $0x344] ss:$16 sps:$4 sm:$0xff]  }
 0x278   : > { %3856 = vmatprep.subr.bf16.mxu1 %v4996_v18  ;;  %3730 = vmatpush1.bf16.msra.mxu0 %v4995_v19  ;;  %v5061_v18 = vld [vmem:[#allocation6 + $0x340] ss:$16 sps:$4 sm:$0xff]   ;;  %v5064_v19 = vld [vmem:[#allocation6 + $0x348] ss:$16 sps:$4 sm:$0xff]  }
 0x279   : > { %3732 = vmatprep.subr.bf16.mxu0 %v4999_v21  ;;  %v5068_v21 = vld [vmem:[#allocation6 + $0x36c] ss:$16 sps:$4 sm:$0xff]  }
 0x27b   : > { %3858 = vmatpush1.bf16.msra.mxu1 %v4998_v20  ;;  %v5065_v20 = vld [vmem:[#allocation6 + $0x364] ss:$16 sps:$4 sm:$0xff]  }
 0x27c   : > { %3860 = vmatprep.subr.bf16.mxu1 %v5002_v22  ;;  %v5067_v22 = vld [vmem:[#allocation6 + $0x360] ss:$16 sps:$4 sm:$0xff]  }
 0x30e   : > { %v1646_v32 = vpop.f32.mrb[0].mxu0 }
 0x30f   : > { %v3991_v34 = vadd.f32 %v1646_v32, %v1492_v29  ;;  %v1648_v35 = vpop.f32.mrb[1].mxu0  ;;  %v5071_v29 = vld [vmem:[#allocation6 + $0x384] ss:$16 sps:$4 sm:$0xff]   ;;  %v5076_v32 = vld [vmem:[#allocation6 + $0x388] ss:$16 sps:$4 sm:$0xff]  }
 0x310   : > { %v3992_v37 = vadd.f32 %v1648_v35, %v1496_v30  ;;  %v5074_v30 = vld [vmem:[#allocation6 + $0x38c] ss:$16 sps:$4 sm:$0xff]  }
 0x311   : > { %v6148_v33 = vpop.f32.mrb[0].mxu1  ;;  %v1793_v42 = vmax.f32 %v3991_v34, 0.0  ;;  %v5077_v34 = vld [vmem:[#allocation6 + $0x3a4] ss:$16 sps:$4 sm:$0xff]   ;;  %v5080_v35 = vld [vmem:[#allocation6 + $0x3ac] ss:$16 sps:$4 sm:$0xff]  }
 0x312   : > { %v1790_v36 = vpop.f32.mrb[1].mxu1  ;;  %v1794_v39 = vmax.f32 %v3992_v37, 0.0  ;;  %v5082_v37 = vld [vmem:[#allocation6 + $0x3a8] ss:$16 sps:$4 sm:$0xff]  }
 0x313   : > { %v3994_v38 = vadd.f32 %v1790_v36, %v1504_v31  ;;  %v5073_v31 = vld [vmem:[#allocation6 + $0x380] ss:$16 sps:$4 sm:$0xff]  }
 0x314   : > { %2267 = vmatprep.mubr.f32.mxu0 %v1794_v39  ;;  %2409 = vmatprep.mubr.f32.mxu1 %v1794_v39  ;;  %v5079_v36 = vld [vmem:[#allocation6 + $0x3a0] ss:$16 sps:$4 sm:$0xff]   ;;  %v5083_v39 = vld [vmem:[#allocation6 + $0x3c4] ss:$16 sps:$4 sm:$0xff]  }
 0x315   : > { %v1796_v45 = vmax.f32 %v3994_v38, 0.0  ;;  %2268 = vmatmul.mubr.f32.vlgmr.msra.gmra.mrb[2].mxu0 %v1793_v42  ;;  %2410 = vmatmul.mubr.f32.vlgmr.msra.gmra.mrb[2].mxu1 %v1793_v42  ;;  %v1499_v38 = vsub.s32 2, %v6129_v24  ;;  %v5088_v42 = vld [vmem:[#allocation6 + $0x3c8] ss:$16 sps:$4 sm:$0xff]  }
 0x316   : > { %3734 = vmatpush1.bf16.msra.mxu0 %v5001_v40  ;;  %3862 = vmatpush1.bf16.msra.mxu1 %v5004_v41  ;;  %v5086_v40 = vld [vmem:[#allocation6 + $0x3cc] ss:$16 sps:$4 sm:$0xff]   ;;  %v5085_v41 = vld [vmem:[#allocation6 + $0x3c0] ss:$16 sps:$4 sm:$0xff]  }
 0x317   : > { %2338 = vmatprep.mubr.f32.mxu0 %v1796_v45  ;;  %2480 = vmatprep.mubr.f32.mxu1 %v1796_v45  ;;  %v5092_v45 = vld [vmem:[#allocation6 + $0x3ec] ss:$16 sps:$4 sm:$0xff]  }
 0x318   : > { %3736 = vmatprep.subr.bf16.mxu0 %v5005_v43  ;;  %3864 = vmatprep.subr.bf16.mxu1 %v5008_v44  ;;  %v1500_v43 = vrot.slane %v6135_v26, %v1499_v38  ;;  %v5089_v44 = vld [vmem:[#allocation6 + $0x3e4] ss:$16 sps:$4 sm:$0xff]  }
 0x319   : > { %v2927_v26 = vld [vmem:[#allocation8] sm:$0xff]  }
 0x31a   : > { %3738 = vmatpush1.bf16.msra.mxu0 %v5007_v46  ;;  %3866 = vmatpush1.bf16.msra.mxu1 %v5010_v47  ;;  %v5091_v46 = vld [vmem:[#allocation6 + $0x3e0] ss:$16 sps:$4 sm:$0xff]   ;;  %v5094_v47 = vld [vmem:[#allocation6 + $0x3e8] ss:$16 sps:$4 sm:$0xff]  }
 0x31b   : > { %3740 = vmatprep.subr.bf16.mxu0 %v5011_v48  ;;  %3868 = vmatprep.subr.bf16.mxu1 %v5014_v49  ;;  %v3993_v48 = vadd.f32 %v6148_v33, %v1500_v43  ;;  %v3061_v49 = vld [vmem:[#allocation8 + $0x40] sm:$0xff]   ;;  %v3054_v33 = vld [vmem:[#allocation8 + $0x8] sm:$0xff]  }
 0x31e   : > { %3742 = vmatpush1.bf16.msra.mxu0 %v5013_v50  ;;  %3870 = vmatpush1.bf16.msra.mxu1 %v5016_v51  ;;  %v3077_v50 = vld [vmem:[#allocation8 + $0xc0] sm:$0xff]   ;;  %v1795_v51 = vmax.f32 %v3993_v48, 0.0 }
 0x31f   : > { %3744 = vmatprep.subr.bf16.mxu0 %v5017_v52  ;;  %3872 = vmatprep.subr.bf16.mxu1 %v5020_v53  ;;  %v3069_v52 = vld [vmem:[#allocation8 + $0x80] sm:$0xff]   ;;  %v3062_v53 = vld [vmem:[#allocation8 + $0x48] sm:$0xff]  }
 0x322   : > { %3746 = vmatpush1.bf16.msra.mxu0 %v5019_v54  ;;  %3874 = vmatpush1.bf16.msra.mxu1 %v5022_v55  ;;  %v3078_v54 = vld [vmem:[#allocation8 + $0xc8] sm:$0xff]  }
 0x323   : > { %3748 = vmatprep.subr.bf16.mxu0 %v5023_v56  ;;  %3876 = vmatprep.subr.bf16.mxu1 %v5026_v57  ;;  %v3070_v55 = vld [vmem:[#allocation8 + $0x88] sm:$0xff]   ;;  %v3063_v56 = vld [vmem:[#allocation8 + $0x50] sm:$0xff]  }
 0x324   : > { %v3079_v57 = vld [vmem:[#allocation8 + $0xd0] sm:$0xff]  }
 0x326   : > { %3750 = vmatpush1.bf16.msra.mxu0 %v5025_v58  ;;  %3878 = vmatpush1.bf16.msra.mxu1 %v5028_v59  ;;  %v3055_v58 = vld [vmem:[#allocation8 + $0x10] sm:$0xff]  }
 0x327   : > { %3752 = vmatprep.subr.bf16.mxu0 %v5029_v60  ;;  %3880 = vmatprep.subr.bf16.mxu1 %v5032_v61  ;;  %v3071_v59 = vld [vmem:[#allocation8 + $0x90] sm:$0xff]   ;;  %v3064_v60 = vld [vmem:[#allocation8 + $0x58] sm:$0xff]  }
 0x328   : > { %v3080_v61 = vld [vmem:[#allocation8 + $0xd8] sm:$0xff]  }
 0x32a   : > { %3754 = vmatpush1.bf16.msra.mxu0 %v5031_v62  ;;  %3882 = vmatpush1.bf16.msra.mxu1 %v5034_v63  ;;  %v3056_v62 = vld [vmem:[#allocation8 + $0x18] sm:$0xff]  }
 0x32b   : > { %3756 = vmatprep.subr.bf16.mxu0 %v5035_v0  ;;  %3884 = vmatprep.subr.bf16.mxu1 %v5038_v1  ;;  %v3072_v63 = vld [vmem:[#allocation8 + $0x98] sm:$0xff]   ;;  %v3065_v0 = vld [vmem:[#allocation8 + $0x60] sm:$0xff]  }
 0x32c   : > { %v3081_v1 = vld [vmem:[#allocation8 + $0xe0] sm:$0xff]  }
 0x32e   : > { %3758 = vmatpush1.bf16.msra.mxu0 %v5037_v2  ;;  %3886 = vmatpush1.bf16.msra.mxu1 %v5040_v3  ;;  %v3057_v2 = vld [vmem:[#allocation8 + $0x20] sm:$0xff]  }
 0x32f   : > { %3760 = vmatprep.subr.bf16.mxu0 %v5041_v4  ;;  %3888 = vmatprep.subr.bf16.mxu1 %v5044_v5  ;;  %v3073_v3 = vld [vmem:[#allocation8 + $0xa0] sm:$0xff]   ;;  %v3066_v4 = vld [vmem:[#allocation8 + $0x68] sm:$0xff]  }
 0x330   : > { %v3082_v5 = vld [vmem:[#allocation8 + $0xe8] sm:$0xff]  }
 0x332   : > { %3762 = vmatpush1.bf16.msra.mxu0 %v5043_v6  ;;  %3890 = vmatpush1.bf16.msra.mxu1 %v5046_v7  ;;  %v3058_v6 = vld [vmem:[#allocation8 + $0x28] sm:$0xff]  }
 0x333   : > { %3764 = vmatprep.subr.bf16.mxu0 %v5047_v8  ;;  %3892 = vmatprep.subr.bf16.mxu1 %v5050_v9  ;;  %v3074_v7 = vld [vmem:[#allocation8 + $0xa8] sm:$0xff]   ;;  %v3067_v8 = vld [vmem:[#allocation8 + $0x70] sm:$0xff]  }
 0x334   : > { %v3083_v9 = vld [vmem:[#allocation8 + $0xf0] sm:$0xff]  }
 0x336   : > { %3766 = vmatpush1.bf16.msra.mxu0 %v5049_v10  ;;  %3894 = vmatpush1.bf16.msra.mxu1 %v5052_v11  ;;  %v3059_v10 = vld [vmem:[#allocation8 + $0x30] sm:$0xff]  }
 0x337   : > { %3768 = vmatprep.subr.bf16.mxu0 %v5053_v12  ;;  %3896 = vmatprep.subr.bf16.mxu1 %v5056_v13  ;;  %v3075_v11 = vld [vmem:[#allocation8 + $0xb0] sm:$0xff]   ;;  %v3068_v12 = vld [vmem:[#allocation8 + $0x78] sm:$0xff]  }
 0x338   : > { %v3084_v13 = vld [vmem:[#allocation8 + $0xf8] sm:$0xff]  }
 0x33a   : > { %3770 = vmatpush1.bf16.msra.mxu0 %v5055_v14  ;;  %3898 = vmatpush1.bf16.msra.mxu1 %v5058_v15  ;;  %v3060_v14 = vld [vmem:[#allocation8 + $0x38] sm:$0xff]  }
 0x33b   : > { %3772 = vmatprep.subr.bf16.mxu0 %v5059_v16  ;;  %3900 = vmatprep.subr.bf16.mxu1 %v5062_v17  ;;  %v3076_v15 = vld [vmem:[#allocation8 + $0xb8] sm:$0xff]   ;;  %v2181_v16 = vld [vmem:[%s6282_s7] sm:$0xf] }
 0x33c   : > { %v2186_v17 = vrot.slane %v2181_v16, %v1491_v25 }
 0x33e   : > { %3774 = vmatpush1.bf16.msra.mxu0 %v5061_v18  ;;  %3902 = vmatpush1.bf16.msra.mxu1 %v5064_v19  ;;  %v2194_v18 = vrot.slane %v2181_v16, %v1499_v38  ;;  %v2190_v19 = vrot.slane %v2181_v16, %v1495_v27 }
 0x33f   : > { %3776 = vmatprep.subr.bf16.mxu0 %v5065_v20  ;;  %3904 = vmatprep.subr.bf16.mxu1 %v5068_v21  ;;  %v2198_v20 = vrot.slane %v2181_v16, %v1503_v28  ;;  %v2919_v28 = vld [vmem:[%s6283_s6] ss:$0 sm:$0xff] }
 0x342   : > { %3778 = vmatpush1.bf16.msra.mxu0 %v5067_v22  ;;  %3906 = vmatpush1.bf16.msra.mxu1 %v5070_v23 }
 0x343   : > { %3780 = vmatprep.subr.bf16.mxu0 %v5071_v29  ;;  %3908 = vmatprep.subr.bf16.mxu1 %v5074_v30 }
 0x346   : > { %3782 = vmatpush1.bf16.msra.mxu0 %v5073_v31  ;;  %3910 = vmatpush1.bf16.msra.mxu1 %v5076_v32 }
 0x347   : > { %3784 = vmatprep.subr.bf16.mxu0 %v5077_v34  ;;  %3912 = vmatprep.subr.bf16.mxu1 %v5080_v35 }
 0x34a   : > { %3786 = vmatpush1.bf16.msra.mxu0 %v5079_v36  ;;  %3914 = vmatpush1.bf16.msra.mxu1 %v5082_v37 }
 0x34b   : > { %3788 = vmatprep.subr.bf16.mxu0 %v5083_v39  ;;  %3916 = vmatprep.subr.bf16.mxu1 %v5086_v40 }
 0x34e   : > { %3790 = vmatpush1.bf16.msra.mxu0 %v5085_v41  ;;  %3918 = vmatpush1.bf16.msra.mxu1 %v5088_v42 }
 0x34f   : > { %3792 = vmatprep.subr.bf16.mxu0 %v5089_v44  ;;  %3920 = vmatprep.subr.bf16.mxu1 %v5092_v45 }
 0x352   : > { %3794 = vmatpush1.bf16.msra.mxu0 %v5091_v46  ;;  %3922 = vmatpush1.bf16.msra.mxu1 %v5094_v47 }
 0x353   : > { %3924 = vmatprep.subr.bf16.mxu0 %v3061_v49  ;;  %3956 = vmatprep.subr.bf16.mxu1 %v3077_v50 }
 0x355   : > { %2339 = vmatmul.mubr.f32.vlgmr.msra.gmra.mrb[2].mxu0 %v1795_v51  ;;  %2481 = vmatmul.mubr.f32.vlgmr.msra.gmra.mrb[2].mxu1 %v1795_v51 }
 0x356   : > { %3926 = vmatpush3.bf16.msra.mxu0 %v2927_v26  ;;  %3958 = vmatpush3.bf16.msra.mxu1 %v3069_v52 }
 0x357   : > { %3928 = vmatprep.subr.bf16.mxu0 %v3062_v53  ;;  %3960 = vmatprep.subr.bf16.mxu1 %v3078_v54 }
 0x35a   : > { %3930 = vmatpush3.bf16.msra.mxu0 %v3054_v33  ;;  %3962 = vmatpush3.bf16.msra.mxu1 %v3070_v55 }
 0x35b   : > { %3932 = vmatprep.subr.bf16.mxu0 %v3063_v56  ;;  %3964 = vmatprep.subr.bf16.mxu1 %v3079_v57 }
 0x35e   : > { %3934 = vmatpush3.bf16.msra.mxu0 %v3055_v58  ;;  %3966 = vmatpush3.bf16.msra.mxu1 %v3071_v59 }
 0x35f   : > { %3936 = vmatprep.subr.bf16.mxu0 %v3064_v60  ;;  %3968 = vmatprep.subr.bf16.mxu1 %v3080_v61 }
 0x362   : > { %3938 = vmatpush3.bf16.msra.mxu0 %v3056_v62  ;;  %3970 = vmatpush3.bf16.msra.mxu1 %v3072_v63 }
 0x363   : > { %3940 = vmatprep.subr.bf16.mxu0 %v3065_v0  ;;  %3972 = vmatprep.subr.bf16.mxu1 %v3081_v1 }
 0x366   : > { %3942 = vmatpush3.bf16.msra.mxu0 %v3057_v2  ;;  %3974 = vmatpush3.bf16.msra.mxu1 %v3073_v3 }
 0x367   : > { %3944 = vmatprep.subr.bf16.mxu0 %v3066_v4  ;;  %3976 = vmatprep.subr.bf16.mxu1 %v3082_v5 }
 0x36a   : > { %3946 = vmatpush3.bf16.msra.mxu0 %v3058_v6  ;;  %3978 = vmatpush3.bf16.msra.mxu1 %v3074_v7 }
 0x36b   : > { %3948 = vmatprep.subr.bf16.mxu0 %v3067_v8  ;;  %3980 = vmatprep.subr.bf16.mxu1 %v3083_v9 }
 0x36e   : > { %3950 = vmatpush3.bf16.msra.mxu0 %v3059_v10  ;;  %3982 = vmatpush3.bf16.msra.mxu1 %v3075_v11 }
 0x36f   : > { %3952 = vmatprep.subr.bf16.mxu0 %v3068_v12  ;;  %3984 = vmatprep.subr.bf16.mxu1 %v3084_v13 }
 0x372   : > { %3954 = vmatpush3.bf16.msra.mxu0 %v3060_v14  ;;  %3986 = vmatpush3.bf16.msra.mxu1 %v3076_v15 }
 0x428   : > { %v2340_v21 = vpop.f32.mrb[2].mxu0  ;;  %v2482_v22 = vpop.f32.mrb[2].mxu1 }
 0x429   : > { %v3995_v23 = vadd.f32 %v2340_v21, %v2186_v17  ;;  %v3997_v29 = vadd.f32 %v2482_v22, %v2194_v18  ;;  %v2342_v30 = vpop.f32.mrb[3].mxu0  ;;  %v2484_v31 = vpop.f32.mrb[3].mxu1 }
 0x42a   : > { %v3996_v32 = vadd.f32 %v2342_v30, %v2190_v19  ;;  %v3998_v34 = vadd.f32 %v2484_v31, %v2198_v20 }
 0x42b   : > { %v2487_v25 = vmax.f32 %v3995_v23, 0.0  ;;  %v2489_v37 = vmax.f32 %v3997_v29, 0.0 }
 0x42c   : > { %v2488_v35 = vmax.f32 %v3996_v32, 0.0  ;;  %v2490_v36 = vmax.f32 %v3998_v34, 0.0 }
 0x42e   : > { %2690 = vmatprep.mubr.f32.mxu0 %v2488_v35  ;;  %2760 = vmatprep.mubr.f32.mxu1 %v2490_v36 }
 0x42f   : > { %2691 = vmatmul.mubr.f32.vlgmr.msra.gmra.mrb[4].mxu0 %v2487_v25  ;;  %2761 = vmatmul.mubr.f32.vlgmr.msra.gmra.mrb[4].mxu1 %v2489_v37 }
 0x502   : > { %v3117_v27 = vpop.f32.mrb[4].mxu0  ;;  %v3152_v24 = vpop.f32.mrb[4].mxu1 }
 0x503   : > { %v3118_v38 = vpop.f32.mrb[5].mxu0  ;;  %v3153_v39 = vpop.f32.mrb[5].mxu1 }
 0x504   : > { %v3119_v40 = vadd.f32 %v3118_v38, %v3117_v27  ;;  %v3154_v41 = vadd.f32 %v3153_v39, %v3152_v24 }
 0x506   : > { %v2693_v42 = vadd.f32 %v3119_v40, %v2919_v28 }
 0x508   : > { %v2763_v43 = vadd.f32 %v3154_v41, %v2693_v42 }
 0x50a   : > { %2766 = vst [vmem:[%s391_s24] sm:$0xff] %v2763_v43 }
 0x50b PF: > { %s6284_s20 = sld [smem:[#allocation14_spill]]  ;;  %s2921_s17 = sshll.u32 %s5295_s12, 7 }
 0x50c   : > { %s6285_s19 = sld [smem:[#allocation21_spill]]  ;;  %s2781_s3 = sshll.u32 %s391_s24, 4  ;;  %s2782_s3 = int_to_ptr.vmem [resolvable:$true] %s2781_s3 }
 0x50d   : > { %s2768_s27 = scalar_lea.sflag [#allocation5], %s389_s4  ;;  %s5181_s5 = scalar_lea.vmem %s2782_s3, 128 }
 0x50e   : > { %p5182_p9 = scmp.ne.s32.totalorder %s2782_s3, %s5181_s5  ;;  %s5317_s7 = smov [#allocation9]  }
 0x50f   : > { %s5185_s16 = sshll.u32 %s5317_s7, 4  ;;  %s5186_s16 = int_to_ptr.vmem [resolvable:$false] %s5185_s16 }
 0x510   : > { %s5187_s26 = scalar_lea.vmem %s5186_s16, 256  ;;  %p5188_p8 = scmp.lt.s32.totalorder %s2782_s3, %s5186_s16 }
 0x511   : > { %p6286_p11 = scmp.ne.s32.totalorder %s6284_s20, 0  ;;  %p5189_p12 = scmp.lt.s32.totalorder %s5187_s26, %s5181_s5 }
 0x512   : > { %s6175_s18 = scalar_lea.hbm %s6285_s19, %s2921_s17 }
 0x513   : > { %p5183_p0 = pnand %p5182_p9, %p6286_p11  ;;  %p5190_p2 = por %p5189_p12, %p5188_p8 }
 0x515   : > { %p5184_p5 = pneg %p5183_p0 }
 0x517   : > { %p5191_p6 = pnand %p5190_p2, %p5184_p5 }
 0x519   : > { %5194 = shalt.err (!%p5191_p6)
}
 0x51a   : > { %s5195_s12 = scalar_lea.hbm %s6175_s18, 128  ;;  %s5199_s24 = scalar_lea.hbm %s6285_s19, 256 }
 0x51b   : > { %p5196_p10 = scmp.ne.s32.totalorder %s6175_s18, %s5195_s12  ;;  %p5200_p3 = scmp.lt.u32.totalorder %s6175_s18, %s6285_s19 }
 0x51c   : > { %p5201_p7 = scmp.lt.u32.totalorder %s5199_s24, %s5195_s12  ;;  %p5203_p9 = scmp.lt.u32.totalorder %s5195_s12, %s6175_s18 }
 0x51d   : > { %p5197_p1 = pnand %p5196_p10, %p6286_p11 }
 0x51e   : > { %p5202_p13 = por %p5201_p7, %p5200_p3 }
 0x51f   : > { %p5198_p4 = pneg %p5197_p1 }
 0x520   : > { %p5204_p0 = por %p5203_p9, %p5202_p13 }
 0x522   : > { %p5205_p5 = pnand %p5204_p0, %p5198_p4 }
 0x524   : > { %5208 = shalt.err (!%p5205_p5)
}
 0x525   : > { %4401 = dma.vmem_to_hbm [thread:$0]  (%p6286_p11), %s2782_s3, 128, %s6175_s18, %s2768_s27  }
 0x526 PF: > { %s6287_s25 = sld [smem:[#allocation13_spill]]  ;;  %s6288_s11 = sld [smem:[#allocation15_spill]] }
 0x527   : > { %p4423_p8 = scmp.ge.s32.totalorder %s5307_s15, 2 }
 0x52c   : > { %s2793_s5 = sand.u32 1, %s6287_s25   ;;  %p6289_p12 = scmp.ne.s32.totalorder %s6288_s11, 0 }
 0x52d   : > { %s2794_s7 = scalar_lea.sflag [#allocation5], %s2793_s5 }
 0x52e   : > { %p4415_p2 = pnand %p4423_p8, %p6289_p12 }
 0x530   : > { %5262 = dma.done.wait (!%p4415_p2), %s2794_s7, 128  }
 0x531   : > { %5264 = vsyncadd (!%p4415_p2), %s2794_s7, 4294967168  ;;  %s25_s15 = sadd.s32 1, %s5307_s15   ;;  %s6290_s20 = smov %s5528_s30 }
 0x532   : > { %p22_p6 = scmp.ge.s32.totalorder %s25_s15, 6   ;;  %s6291_s27 = smov %s5271_s28 }
 0x533   : > { %s6292_s28 = smov %s5275_s29  ;;  %s6293_s29 = smov %s5536_s8 }
 0x534   : > { %s6294_s30 = smov %s5283_s9  ;;  %s6295_s9 = smov %s5287_s10 }
 0x535   : > { %s6296_s10 = smov %s6290_s20  ;;  %s6297_s11 = smov %s5299_s13 }
 0x536   : > { %s6298_s12 = smov %s5303_s14  ;;  %s6299_s13 = smov %s6302_s21 }
 0x537   : > { %s6300_s14 = smov %s6306_s22  ;;  %24 = sbr.rel (!%p22_p6) target bundleno = 17 (0x11), region = 116 }
 0x53e   :  { %2799 = vsyncpa [#allocation4], 1 }
 0x53f   :  { %2801 = vsyncpa [#allocation4 + $0x1], 1 }
 0x540   :  { %2802 = vsyncpa [#allocation7], 1 }
 0x541   :  { %2803 = vsyncpa [#allocation5], 1 }
 0x542   :  { %2805 = vsyncpa [#allocation5 + $0x1], 1 }

</bundles_post_ra>
